<compile_context>
chip_gen: v6e
topology: v6e:2x2x1
jax: 0.10.0
libtpu: 0.0.40
codegen_flags: <defaults>
</compile_context>

<pallas_src>
import functools

import jax
import jax.numpy as jnp
from jax import lax
from jax.experimental import pallas as pl
from jax.experimental.pallas import tpu as pltpu

LANE = 128     # lane width (last-dim alignment)
SUBLANE = 8    # f32 sublane width (second-last-dim alignment)

# Packed gate slot -> PyTorch gate index.  Packed order is [i, f, o, g] so the
# three sigmoid gates are contiguous; PyTorch stacks [i, f, g, o].
_GATE_ORDER = (0, 1, 3, 2)


def _round_up(x, m):
    return ((x + m - 1) // m) * m


def _gate_block(H):
    """Lane width of one gate block.  Compact for H < 128 (4*gb still a
    multiple of 128 lanes); 128-aligned for H >= 128."""
    if H >= LANE:
        return _round_up(H, LANE)
    return _round_up(H, LANE // 4)


# ----------------------------------------------------------------------------
# Tiled matmul + bias: (N, K) @ (K, M) + (1, M) -> (N, M).
# Used for the hoisted per-layer input projection over all timesteps.
# Operands are bf16, accumulation f32, output dtype selectable.
# ----------------------------------------------------------------------------
def _matmul_bias_kernel(x_ref, w_ref, b_ref, o_ref):
    o_ref[...] = (
        jnp.dot(x_ref[...], w_ref[...], preferred_element_type=jnp.float32)
        + b_ref[...]
    ).astype(o_ref.dtype)


def matmul_bias(x2d, w_t, bias, out_dtype=jnp.bfloat16, row_tile=512):
    """x2d: (N, K) bf16, w_t: (K, M) bf16, bias: (1, M) f32 -> (N, M)."""
    N, K = x2d.shape
    M = w_t.shape[1]
    # Balanced row tiles (avoid a nearly-empty remainder tile).
    n_tiles = max(1, -(-N // row_tile))
    tr = _round_up(-(-N // n_tiles), 2 * SUBLANE)   # 16-row aligned (bf16 safe)
    Np = n_tiles * tr
    if Np != N:
        x2d = jnp.pad(x2d, ((0, Np - N), (0, 0)))
    out = pl.pallas_call(
        _matmul_bias_kernel,
        out_shape=jax.ShapeDtypeStruct((Np, M), out_dtype),
        grid=(n_tiles,),
        in_specs=[
            pl.BlockSpec((tr, K), lambda i: (i, 0)),
            pl.BlockSpec((K, M), lambda i: (0, 0)),
            pl.BlockSpec((1, M), lambda i: (0, 0)),
        ],
        out_specs=pl.BlockSpec((tr, M), lambda i: (i, 0)),
        compiler_params=pltpu.CompilerParams(
            dimension_semantics=("parallel",)),
    )(x2d, w_t, bias)
    return out[:N] if Np != N else out


# ----------------------------------------------------------------------------
# LSTM recurrence kernel.  Grid iterates sequentially over timestep chunks of
# size tt.  Each grid step consumes a (tt, Bp, 4*gb) precomputed bf16 gate
# slab.  (h, c) are carried in registers inside the chunk and persisted in
# VMEM scratch across chunks.  The last layer additionally fuses the output
# Linear (fc) over the whole chunk.
# ----------------------------------------------------------------------------
def _lstm_chunk_kernel(*refs, tt, bp, gb, fuse_fc):
    if fuse_fc:
        (gx_ref, whh_ref, wfc_ref, bfc_ref,
         out_ref, h_ref, c_ref, hbuf_ref) = refs
    else:
        gx_ref, whh_ref, out_ref, h_ref, c_ref, hbuf_ref = refs

    @pl.when(pl.program_id(0) == 0)
    def _():
        h_ref[...] = jnp.zeros_like(h_ref)
        c_ref[...] = jnp.zeros_like(c_ref)

    def step(s, carry):
        h, c = carry
        # gates = (x_t @ W_ih^T + b) [precomputed, bf16]  +  h @ W_hh^T
        gates = gx_ref[s].astype(jnp.float32) + jnp.dot(
            h.astype(jnp.bfloat16), whh_ref[...],
            preferred_element_type=jnp.float32)
        # Packed gate order [i, f, o, g]: one sigmoid over 3 blocks, one tanh.
        sig = jax.nn.sigmoid(gates[:, : 3 * gb])
        i_g = sig[:, :gb]
        f_g = sig[:, gb: 2 * gb]
        o_g = sig[:, 2 * gb: 3 * gb]
        g_g = jnp.tanh(gates[:, 3 * gb:])
        c_new = f_g * c + i_g * g_g
        h_new = o_g * jnp.tanh(c_new)
        row = pl.multiple_of(s * bp, bp)
        hbuf_ref[pl.ds(row, bp), :] = h_new        # off the serial h->h path
        return h_new, c_new

    h_fin, c_fin = lax.fori_loop(
        0, tt, step, (h_ref[...], c_ref[...]), unroll=min(8, tt))
    h_ref[...] = h_fin
    c_ref[...] = c_fin

    if fuse_fc:
        out = jnp.dot(hbuf_ref[...].astype(jnp.bfloat16), wfc_ref[...],
                      preferred_element_type=jnp.float32) + bfc_ref[...]
        out_ref[...] = out.astype(out_ref.dtype)
    else:
        out_ref[...] = hbuf_ref[...].astype(out_ref.dtype)


def lstm_recurrence(gx, w_hh_t, gb, tt, fc=None):
    """gx: (Tp, Bp, 4*gb) bf16 gate slab; w_hh_t: (gb, 4*gb) bf16.
    Returns (Tp*Bp, gb) bf16 hidden states, or (Tp*Bp, Op) f32 if fc given."""
    Tp, Bp, G = gx.shape
    n_chunks = Tp // tt
    scratch = [
        pltpu.VMEM((Bp, gb), jnp.float32),          # h carry
        pltpu.VMEM((Bp, gb), jnp.float32),          # c carry
        pltpu.VMEM((tt * Bp, gb), jnp.float32),     # chunk hidden buffer
    ]
    gx_spec = pl.BlockSpec((tt, Bp, G), lambda t: (t, 0, 0))
    whh_spec = pl.BlockSpec((gb, G), lambda t: (0, 0))
    compiler_params = pltpu.CompilerParams(
        dimension_semantics=("arbitrary",))         # true recurrence

    if fc is None:
        kernel = functools.partial(
            _lstm_chunk_kernel, tt=tt, bp=Bp, gb=gb, fuse_fc=False)
        return pl.pallas_call(
            kernel,
            out_shape=jax.ShapeDtypeStruct((Tp * Bp, gb), jnp.bfloat16),
            grid_spec=pltpu.PrefetchScalarGridSpec(
                num_scalar_prefetch=0,
                grid=(n_chunks,),
                in_specs=[gx_spec, whh_spec],
                out_specs=pl.BlockSpec((tt * Bp, gb), lambda t: (t, 0)),
                scratch_shapes=scratch,
            ),
            compiler_params=compiler_params,
        )(gx, w_hh_t)

    w_fc_t, b_fc = fc
    Op = w_fc_t.shape[1]
    kernel = functools.partial(
        _lstm_chunk_kernel, tt=tt, bp=Bp, gb=gb, fuse_fc=True)
    return pl.pallas_call(
        kernel,
        out_shape=jax.ShapeDtypeStruct((Tp * Bp, Op), jnp.float32),
        grid_spec=pltpu.PrefetchScalarGridSpec(
            num_scalar_prefetch=0,
            grid=(n_chunks,),
            in_specs=[
                gx_spec,
                whh_spec,
                pl.BlockSpec((gb, Op), lambda t: (0, 0)),
                pl.BlockSpec((1, Op), lambda t: (0, 0)),
            ],
            out_specs=pl.BlockSpec((tt * Bp, Op), lambda t: (t, 0)),
            scratch_shapes=scratch,
        ),
        compiler_params=compiler_params,
    )(gx, w_hh_t, w_fc_t, b_fc)


# ----------------------------------------------------------------------------
# Parameter construction.  PyTorch-style uniform(-1/sqrt(H), 1/sqrt(H)).
# Kernel params are packed / gate-block-aligned bf16; raw f32 kept for ref.
# ----------------------------------------------------------------------------
def _pack_gate_weight_t(w, H, gb, K, Kp):
    """PyTorch (4H, K) gate-stacked weight -> (Kp, 4*gb) transposed bf16, with
    packed gate order [i, f, o, g]; padding is zero."""
    out = jnp.zeros((Kp, 4 * gb), jnp.float32)
    for slot, g in enumerate(_GATE_ORDER):
        out = out.at[:K, slot * gb: slot * gb + H].set(
            w[g * H:(g + 1) * H, :].T)
    return out.astype(jnp.bfloat16)


def _pack_gate_bias(b, H, gb):
    out = jnp.zeros((1, 4 * gb), jnp.float32)
    for slot, g in enumerate(_GATE_ORDER):
        out = out.at[0, slot * gb: slot * gb + H].set(b[g * H:(g + 1) * H])
    return out


def init_params(key, input_dim, hidden_dim, num_layers, output_dim):
    H = hidden_dim
    gb = _gate_block(H)
    Dp = _round_up(input_dim, LANE)
    Op = _round_up(output_dim, LANE)
    bound = 1.0 / (H ** 0.5)

    kernel_params = {"layers": [], "fc": None}
    ref_params = {"layers": [], "fc": None}

    for layer in range(num_layers):
        d_in = input_dim if layer == 0 else H
        kp_in = Dp if layer == 0 else gb
        key, k1, k2, k3, k4 = jax.random.split(key, 5)
        w_ih = jax.random.uniform(k1, (4 * H, d_in), jnp.float32, -bound, bound)
        w_hh = jax.random.uniform(k2, (4 * H, H), jnp.float32, -bound, bound)
        b_ih = jax.random.uniform(k3, (4 * H,), jnp.float32, -bound, bound)
        b_hh = jax.random.uniform(k4, (4 * H,), jnp.float32, -bound, bound)
        kernel_params["layers"].append({
            "w_ih_t": _pack_gate_weight_t(w_ih, H, gb, d_in, kp_in),  # (Kp,4gb) bf16
            "w_hh_t": _pack_gate_weight_t(w_hh, H, gb, H, gb),        # (gb,4gb) bf16
            "bias": _pack_gate_bias(b_ih + b_hh, H, gb),              # (1,4gb) f32
        })
        ref_params["layers"].append({
            "w_ih": w_ih, "w_hh": w_hh, "bias": b_ih + b_hh,
        })

    key, k1, k2 = jax.random.split(key, 3)
    w_fc = jax.random.uniform(k1, (output_dim, H), jnp.float32, -bound, bound)
    b_fc = jax.random.uniform(k2, (output_dim,), jnp.float32, -bound, bound)
    w_fc_t = (jnp.zeros((gb, Op), jnp.float32)
              .at[:H, :output_dim].set(w_fc.T).astype(jnp.bfloat16))
    b_fc_p = jnp.zeros((1, Op), jnp.float32).at[0, :output_dim].set(b_fc)
    kernel_params["fc"] = {"w_t": w_fc_t, "bias": b_fc_p}
    ref_params["fc"] = {"w": w_fc, "b": b_fc}
    return kernel_params, ref_params


# ----------------------------------------------------------------------------
# Forward pass (PyTorch semantics: x is (B, T, input_dim), batch_first=True).
# ----------------------------------------------------------------------------
@functools.partial(jax.jit, static_argnames=("output_dim", "tt_max"))
def lstm_seq2seq_forward(x, params, *, output_dim, tt_max=32):
    B, T, D = x.shape
    layers = params["layers"]
    gb = layers[0]["w_hh_t"].shape[0]
    Dp = layers[0]["w_ih_t"].shape[0]
    Op = params["fc"]["w_t"].shape[1]
    Bp = _round_up(B, SUBLANE)
    tt = min(tt_max, T)
    Tp = _round_up(T, tt)

    # Pad to lane/sublane-dense shapes, go time-major, flatten to (Tp*Bp, Dp).
    xp = jnp.pad(x, ((0, Bp - B), (0, Tp - T), (0, Dp - D)))
    h2d = jnp.transpose(xp, (1, 0, 2)).reshape(Tp * Bp, Dp).astype(jnp.bfloat16)

    n_layers = len(layers)
    out2d = None
    for li, lp in enumerate(layers):
        K = h2d.shape[-1]
        # Hoisted input projection + bias over all timesteps (one big matmul).
        gx = matmul_bias(h2d, lp["w_ih_t"], lp["bias"], out_dtype=jnp.bfloat16)
        gx = gx.reshape(Tp, Bp, 4 * gb)
        if li < n_layers - 1:
            # Sequential part: only h @ W_hh^T + pointwise cell per step.
            h2d = lstm_recurrence(gx, lp["w_hh_t"], gb, tt)
        else:
            # Last layer: fuse the per-timestep output Linear into the chunk.
            out2d = lstm_recurrence(gx, lp["w_hh_t"], gb, tt,
                                    fc=(params["fc"]["w_t"],
                                        params["fc"]["bias"]))

    out = out2d.reshape(Tp, Bp, Op)[:T, :B, :output_dim]
    return jnp.transpose(out, (1, 0, 2))  # back to (B, T, output_dim)


# ----------------------------------------------------------------------------
# Pure-JAX reference (lax.scan LSTM with unpadded PyTorch-layout weights).
# ----------------------------------------------------------------------------
def _ref_lstm_layer(h_seq, w_ih, w_hh, bias, B, H):
    def step(carry, x_t):
        h, c = carry
        gates = x_t @ w_ih.T + h @ w_hh.T + bias
        i = jax.nn.sigmoid(gates[:, :H])
        f = jax.nn.sigmoid(gates[:, H:2 * H])
        g = jnp.tanh(gates[:, 2 * H:3 * H])
        o = jax.nn.sigmoid(gates[:, 3 * H:])
        c = f * c + i * g
        h = o * jnp.tanh(c)
        return (h, c), h

    init = (jnp.zeros((B, H), jnp.float32), jnp.zeros((B, H), jnp.float32))
    _, out = lax.scan(step, init, h_seq)
    return out


def reference_forward(x, ref_params):
    B, T, _ = x.shape
    h_seq = jnp.transpose(x, (1, 0, 2))  # (T, B, D)
    for lp in ref_params["layers"]:
        H = lp["w_hh"].shape[1]
        h_seq = _ref_lstm_layer(h_seq, lp["w_ih"], lp["w_hh"], lp["bias"], B, H)
    out = h_seq @ ref_params["fc"]["w"].T + ref_params["fc"]["b"]
    return jnp.transpose(out, (1, 0, 2))


if __name__ == "__main__":
    # Small shapes consistent with the module's forward:
    #   x: (batch, seq, input_dim) -> out: (batch, seq, output_dim)
    batch, seq_len = 2, 8
    input_dim, hidden_dim, num_layers, output_dim = 4, 32, 2, 3

    key = jax.random.PRNGKey(0)
    key, xk = jax.random.split(key)
    x = jax.random.normal(xk, (batch, seq_len, input_dim), jnp.float32)

    kernel_params, ref_params = init_params(
        key, input_dim, hidden_dim, num_layers, output_dim)

    out = lstm_seq2seq_forward(x, kernel_params, output_dim=output_dim)
    out = jax.block_until_ready(out)

    ref = reference_forward(x, ref_params)
    assert out.shape == (batch, seq_len, output_dim)
    max_err = float(jnp.max(jnp.abs(out - ref)))
    # bf16 MXU operands / bf16 gate slab -> slightly looser tolerance than f32.
    assert max_err < 1e-2, f"max abs err = {max_err}"

    print("KERNEL_OK")
</pallas_src>

<mosaic_0001>
module attributes {stable_mosaic.version = 11 : i64} {
  func.func @_matmul_bias_kernel(%arg0: i32, %arg1: memref<64x128xbf16, #tpu.memory_space<vmem>>, %arg2: memref<128x128xbf16, #tpu.memory_space<vmem>>, %arg3: memref<1x128xf32, #tpu.memory_space<vmem>>, %arg4: memref<64x128xbf16, #tpu.memory_space<vmem>>) attributes {dimension_semantics = [#tpu.dimension_semantics<parallel>], iteration_bounds = array<i64: 1>, scalar_prefetch = 0 : i64, scratch_operands = 0 : i64, tpu.core_type = #tpu.core_type<tc>, window_params = [{transform_indices = @transform_0, window_bounds = array<i64: 64, 128>}, {pipeline_mode = #tpu.pipeline_mode<synchronous>, transform_indices = @transform_1, window_bounds = array<i64: 128, 128>}, {pipeline_mode = #tpu.pipeline_mode<synchronous>, transform_indices = @transform_2, window_bounds = array<i64: 1, 128>}, {transform_indices = @transform_3, window_bounds = array<i64: 64, 128>}]} {
    %c0 = arith.constant 0 : index
    %c0_0 = arith.constant 0 : index
    %0 = vector.load %arg1[%c0, %c0_0] : memref<64x128xbf16, #tpu.memory_space<vmem>>, vector<64x128xbf16>
    %c0_1 = arith.constant 0 : index
    %c0_2 = arith.constant 0 : index
    %1 = vector.load %arg2[%c0_1, %c0_2] : memref<128x128xbf16, #tpu.memory_space<vmem>>, vector<128x128xbf16>
    %cst = arith.constant dense<0.000000e+00> : vector<64x128xf32>
    %2 = tpu.matmul %0, %1, %cst {dimension_numbers = #tpu.dot_dimension_numbers<[1], [0], [0], [1], [0, 0, 1, 1], [], []>} : vector<64x128xbf16>, vector<128x128xbf16>, vector<64x128xf32> -> vector<64x128xf32>
    %c0_3 = arith.constant 0 : index
    %c0_4 = arith.constant 0 : index
    %3 = vector.load %arg3[%c0_3, %c0_4] : memref<1x128xf32, #tpu.memory_space<vmem>>, vector<1x128xf32>
    %4 = vector.broadcast %3 : vector<1x128xf32> to vector<64x128xf32>
    %5 = arith.addf %2, %4 : vector<64x128xf32>
    %6 = arith.truncf %5 : vector<64x128xf32> to vector<64x128xbf16>
    %c0_5 = arith.constant 0 : index
    %c0_6 = arith.constant 0 : index
    %7 = vector.load %arg4[%c0_5, %c0_6] : memref<64x128xbf16, #tpu.memory_space<vmem>>, vector<64x128xbf16>
    tpu.vector_store %arg4[%c0_5, %c0_6], %6 {strides = array<i32>} : memref<64x128xbf16, #tpu.memory_space<vmem>>, vector<64x128xbf16>,
    return
  }
  func.func @transform_0(%arg0: i32) -> (i32, i32) {
    %c0_i32 = arith.constant 0 : i32
    %c0_i32_0 = arith.constant 0 : i32
    return %arg0, %c0_i32 : i32, i32
  }
  func.func @transform_1(%arg0: i32) -> (i32, i32) {
    %c0_i32 = arith.constant 0 : i32
    %c0_i32_0 = arith.constant 0 : i32
    %c0_i32_1 = arith.constant 0 : i32
    return %c0_i32, %c0_i32_0 : i32, i32
  }
  func.func @transform_2(%arg0: i32) -> (i32, i32) {
    %c0_i32 = arith.constant 0 : i32
    %c0_i32_0 = arith.constant 0 : i32
    %c0_i32_1 = arith.constant 0 : i32
    return %c0_i32, %c0_i32_0 : i32, i32
  }
  func.func @transform_3(%arg0: i32) -> (i32, i32) {
    %c0_i32 = arith.constant 0 : i32
    %c0_i32_0 = arith.constant 0 : i32
    return %arg0, %c0_i32 : i32, i32
  }
}

module attributes {stable_mosaic.version = 11 : i64} {
  func.func @_lstm_chunk_kernel(%arg0: i32, %arg1: memref<8x8x128xbf16, #tpu.memory_space<vmem>>, %arg2: memref<32x128xbf16, #tpu.memory_space<vmem>>, %arg3: memref<64x32xbf16, #tpu.memory_space<vmem>>, %arg4: memref<8x32xf32, #tpu.memory_space<vmem>>, %arg5: memref<8x32xf32, #tpu.memory_space<vmem>>, %arg6: memref<64x32xf32, #tpu.memory_space<vmem>>) attributes {dimension_semantics = [#tpu.dimension_semantics<arbitrary>], iteration_bounds = array<i64: 1>, scalar_prefetch = 0 : i64, scratch_operands = 3 : i64, tpu.core_type = #tpu.core_type<tc>, window_params = [{transform_indices = @transform_0, window_bounds = array<i64: 8, 8, 128>}, {pipeline_mode = #tpu.pipeline_mode<synchronous>, transform_indices = @transform_1, window_bounds = array<i64: 32, 128>}, {transform_indices = @transform_2, window_bounds = array<i64: 64, 32>}]} {
    %c0_i32 = arith.constant 0 : i32
    %0 = arith.cmpi eq, %arg0, %c0_i32 : i32
    %1 = arith.extui %0 : i1 to i32
    %c0_i32_0 = arith.constant 0 : i32
    %2 = arith.cmpi ne, %1, %c0_i32_0 : i32
    scf.if %2 {
      %cst_76 = arith.constant 0.000000e+00 : f32
      %234 = vector.broadcast %cst_76 : f32 to vector<8x32xf32>
      %c0_77 = arith.constant 0 : index
      %c0_78 = arith.constant 0 : index
      %235 = vector.load %arg4[%c0_77, %c0_78] : memref<8x32xf32, #tpu.memory_space<vmem>>, vector<8x32xf32>
      tpu.vector_store %arg4[%c0_77, %c0_78], %234 {strides = array<i32>} : memref<8x32xf32, #tpu.memory_space<vmem>>, vector<8x32xf32>,
      %cst_79 = arith.constant 0.000000e+00 : f32
      %236 = vector.broadcast %cst_79 : f32 to vector<8x32xf32>
      %c0_80 = arith.constant 0 : index
      %c0_81 = arith.constant 0 : index
      %237 = vector.load %arg5[%c0_80, %c0_81] : memref<8x32xf32, #tpu.memory_space<vmem>>, vector<8x32xf32>
      tpu.vector_store %arg5[%c0_80, %c0_81], %236 {strides = array<i32>} : memref<8x32xf32, #tpu.memory_space<vmem>>, vector<8x32xf32>,
    } else {
    }
    %c0 = arith.constant 0 : index
    %c0_1 = arith.constant 0 : index
    %3 = vector.load %arg4[%c0, %c0_1] : memref<8x32xf32, #tpu.memory_space<vmem>>, vector<8x32xf32>
    %c0_2 = arith.constant 0 : index
    %c0_3 = arith.constant 0 : index
    %4 = vector.load %arg5[%c0_2, %c0_3] : memref<8x32xf32, #tpu.memory_space<vmem>>, vector<8x32xf32>
    %c0_i32_4 = arith.constant 0 : i32
    %5 = arith.index_cast %c0_i32_4 : i32 to index
    %c0_5 = arith.constant 0 : index
    %c0_6 = arith.constant 0 : index
    %6 = vector.load %arg1[%5, %c0_5, %c0_6] : memref<8x8x128xbf16, #tpu.memory_space<vmem>>, vector<1x8x128xbf16>
    %7 = vector.shape_cast %6 : vector<1x8x128xbf16> to vector<8x128xbf16>
    %8 = arith.extf %7 : vector<8x128xbf16> to vector<8x128xf32>
    %9 = arith.truncf %3 : vector<8x32xf32> to vector<8x32xbf16>
    %c0_7 = arith.constant 0 : index
    %c0_8 = arith.constant 0 : index
    %10 = vector.load %arg2[%c0_7, %c0_8] : memref<32x128xbf16, #tpu.memory_space<vmem>>, vector<32x128xbf16>
    %cst = arith.constant dense<0.000000e+00> : vector<8x128xf32>
    %11 = tpu.matmul %9, %10, %cst {dimension_numbers = #tpu.dot_dimension_numbers<[1], [0], [0], [1], [0, 0, 1, 1], [], []>} : vector<8x32xbf16>, vector<32x128xbf16>, vector<8x128xf32> -> vector<8x128xf32>
    %12 = arith.addf %8, %11 : vector<8x128xf32>
    %13 = vector.extract_strided_slice %12 {offsets = [0, 0], sizes = [8, 96], strides = [1, 1]} : vector<8x128xf32> to vector<8x96xf32>
    %14 = arith.negf %13 : vector<8x96xf32>
    %15 = math.exp %14 : vector<8x96xf32>
    %cst_9 = arith.constant 1.000000e+00 : f32
    %16 = vector.broadcast %cst_9 : f32 to vector<8x96xf32>
    %17 = arith.addf %16, %15 : vector<8x96xf32>
    %18 = arith.divf %16, %17 : vector<8x96xf32>
    %19 = vector.extract_strided_slice %18 {offsets = [0, 0], sizes = [8, 32], strides = [1, 1]} : vector<8x96xf32> to vector<8x32xf32>
    %20 = vector.extract_strided_slice %18 {offsets = [0, 32], sizes = [8, 32], strides = [1, 1]} : vector<8x96xf32> to vector<8x32xf32>
    %21 = vector.extract_strided_slice %18 {offsets = [0, 64], sizes = [8, 32], strides = [1, 1]} : vector<8x96xf32> to vector<8x32xf32>
    %22 = vector.extract_strided_slice %12 {offsets = [0, 96], sizes = [8, 32], strides = [1, 1]} : vector<8x128xf32> to vector<8x32xf32>
    %23 = math.tanh %22 : vector<8x32xf32>
    %24 = arith.mulf %20, %4 : vector<8x32xf32>
    %25 = arith.mulf %19, %23 : vector<8x32xf32>
    %26 = arith.addf %24, %25 : vector<8x32xf32>
    %27 = math.tanh %26 : vector<8x32xf32>
    %28 = arith.mulf %21, %27 : vector<8x32xf32>
    %c8_i32 = arith.constant 8 : i32
    %29 = arith.muli %c0_i32_4, %c8_i32 : i32
    %30 = tpu.assume_multiple %29, 8 : i32
    %31 = arith.index_cast %30 : i32 to index
    %c0_10 = arith.constant 0 : index
    %32 = vector.load %arg6[%31, %c0_10] : memref<64x32xf32, #tpu.memory_space<vmem>>, vector<8x32xf32>
    tpu.vector_store %arg6[%31, %c0_10], %28 {strides = array<i32>} : memref<64x32xf32, #tpu.memory_space<vmem>>, vector<8x32xf32>,
    %c1_i32 = arith.constant 1 : i32
    %33 = arith.index_cast %c1_i32 : i32 to index
    %c0_11 = arith.constant 0 : index
    %c0_12 = arith.constant 0 : index
    %34 = vector.load %arg1[%33, %c0_11, %c0_12] : memref<8x8x128xbf16, #tpu.memory_space<vmem>>, vector<1x8x128xbf16>
    %35 = vector.shape_cast %34 : vector<1x8x128xbf16> to vector<8x128xbf16>
    %36 = arith.extf %35 : vector<8x128xbf16> to vector<8x128xf32>
    %37 = arith.truncf %28 : vector<8x32xf32> to vector<8x32xbf16>
    %c0_13 = arith.constant 0 : index
    %c0_14 = arith.constant 0 : index
    %38 = vector.load %arg2[%c0_13, %c0_14] : memref<32x128xbf16, #tpu.memory_space<vmem>>, vector<32x128xbf16>
    %cst_15 = arith.constant dense<0.000000e+00> : vector<8x128xf32>
    %39 = tpu.matmul %37, %38, %cst_15 {dimension_numbers = #tpu.dot_dimension_numbers<[1], [0], [0], [1], [0, 0, 1, 1], [], []>} : vector<8x32xbf16>, vector<32x128xbf16>, vector<8x128xf32> -> vector<8x128xf32>
    %40 = arith.addf %36, %39 : vector<8x128xf32>
    %41 = vector.extract_strided_slice %40 {offsets = [0, 0], sizes = [8, 96], strides = [1, 1]} : vector<8x128xf32> to vector<8x96xf32>
    %42 = arith.negf %41 : vector<8x96xf32>
    %43 = math.exp %42 : vector<8x96xf32>
    %cst_16 = arith.constant 1.000000e+00 : f32
    %44 = vector.broadcast %cst_16 : f32 to vector<8x96xf32>
    %45 = arith.addf %44, %43 : vector<8x96xf32>
    %46 = arith.divf %44, %45 : vector<8x96xf32>
    %47 = vector.extract_strided_slice %46 {offsets = [0, 0], sizes = [8, 32], strides = [1, 1]} : vector<8x96xf32> to vector<8x32xf32>
    %48 = vector.extract_strided_slice %46 {offsets = [0, 32], sizes = [8, 32], strides = [1, 1]} : vector<8x96xf32> to vector<8x32xf32>
    %49 = vector.extract_strided_slice %46 {offsets = [0, 64], sizes = [8, 32], strides = [1, 1]} : vector<8x96xf32> to vector<8x32xf32>
    %50 = vector.extract_strided_slice %40 {offsets = [0, 96], sizes = [8, 32], strides = [1, 1]} : vector<8x128xf32> to vector<8x32xf32>
    %51 = math.tanh %50 : vector<8x32xf32>
    %52 = arith.mulf %48, %26 : vector<8x32xf32>
    %53 = arith.mulf %47, %51 : vector<8x32xf32>
    %54 = arith.addf %52, %53 : vector<8x32xf32>
    %55 = math.tanh %54 : vector<8x32xf32>
    %56 = arith.mulf %49, %55 : vector<8x32xf32>
    %c8_i32_17 = arith.constant 8 : i32
    %57 = arith.muli %c1_i32, %c8_i32_17 : i32
    %58 = tpu.assume_multiple %57, 8 : i32
    %59 = arith.index_cast %58 : i32 to index
    %c0_18 = arith.constant 0 : index
    %60 = vector.load %arg6[%59, %c0_18] : memref<64x32xf32, #tpu.memory_space<vmem>>, vector<8x32xf32>
    tpu.vector_store %arg6[%59, %c0_18], %56 {strides = array<i32>} : memref<64x32xf32, #tpu.memory_space<vmem>>, vector<8x32xf32>,
    %c2_i32 = arith.constant 2 : i32
    %61 = arith.index_cast %c2_i32 : i32 to index
    %c0_19 = arith.constant 0 : index
    %c0_20 = arith.constant 0 : index
    %62 = vector.load %arg1[%61, %c0_19, %c0_20] : memref<8x8x128xbf16, #tpu.memory_space<vmem>>, vector<1x8x128xbf16>
    %63 = vector.shape_cast %62 : vector<1x8x128xbf16> to vector<8x128xbf16>
    %64 = arith.extf %63 : vector<8x128xbf16> to vector<8x128xf32>
    %65 = arith.truncf %56 : vector<8x32xf32> to vector<8x32xbf16>
    %c0_21 = arith.constant 0 : index
    %c0_22 = arith.constant 0 : index
    %66 = vector.load %arg2[%c0_21, %c0_22] : memref<32x128xbf16, #tpu.memory_space<vmem>>, vector<32x128xbf16>
    %cst_23 = arith.constant dense<0.000000e+00> : vector<8x128xf32>
    %67 = tpu.matmul %65, %66, %cst_23 {dimension_numbers = #tpu.dot_dimension_numbers<[1], [0], [0], [1], [0, 0, 1, 1], [], []>} : vector<8x32xbf16>, vector<32x128xbf16>, vector<8x128xf32> -> vector<8x128xf32>
    %68 = arith.addf %64, %67 : vector<8x128xf32>
    %69 = vector.extract_strided_slice %68 {offsets = [0, 0], sizes = [8, 96], strides = [1, 1]} : vector<8x128xf32> to vector<8x96xf32>
    %70 = arith.negf %69 : vector<8x96xf32>
    %71 = math.exp %70 : vector<8x96xf32>
    %cst_24 = arith.constant 1.000000e+00 : f32
    %72 = vector.broadcast %cst_24 : f32 to vector<8x96xf32>
    %73 = arith.addf %72, %71 : vector<8x96xf32>
    %74 = arith.divf %72, %73 : vector<8x96xf32>
    %75 = vector.extract_strided_slice %74 {offsets = [0, 0], sizes = [8, 32], strides = [1, 1]} : vector<8x96xf32> to vector<8x32xf32>
    %76 = vector.extract_strided_slice %74 {offsets = [0, 32], sizes = [8, 32], strides = [1, 1]} : vector<8x96xf32> to vector<8x32xf32>
    %77 = vector.extract_strided_slice %74 {offsets = [0, 64], sizes = [8, 32], strides = [1, 1]} : vector<8x96xf32> to vector<8x32xf32>
    %78 = vector.extract_strided_slice %68 {offsets = [0, 96], sizes = [8, 32], strides = [1, 1]} : vector<8x128xf32> to vector<8x32xf32>
    %79 = math.tanh %78 : vector<8x32xf32>
    %80 = arith.mulf %76, %54 : vector<8x32xf32>
    %81 = arith.mulf %75, %79 : vector<8x32xf32>
    %82 = arith.addf %80, %81 : vector<8x32xf32>
    %83 = math.tanh %82 : vector<8x32xf32>
    %84 = arith.mulf %77, %83 : vector<8x32xf32>
    %c8_i32_25 = arith.constant 8 : i32
    %85 = arith.muli %c2_i32, %c8_i32_25 : i32
    %86 = tpu.assume_multiple %85, 8 : i32
    %87 = arith.index_cast %86 : i32 to index
    %c0_26 = arith.constant 0 : index
    %88 = vector.load %arg6[%87, %c0_26] : memref<64x32xf32, #tpu.memory_space<vmem>>, vector<8x32xf32>
    tpu.vector_store %arg6[%87, %c0_26], %84 {strides = array<i32>} : memref<64x32xf32, #tpu.memory_space<vmem>>, vector<8x32xf32>,
    %c3_i32 = arith.constant 3 : i32
    %89 = arith.index_cast %c3_i32 : i32 to index
    %c0_27 = arith.constant 0 : index
    %c0_28 = arith.constant 0 : index
    %90 = vector.load %arg1[%89, %c0_27, %c0_28] : memref<8x8x128xbf16, #tpu.memory_space<vmem>>, vector<1x8x128xbf16>
    %91 = vector.shape_cast %90 : vector<1x8x128xbf16> to vector<8x128xbf16>
    %92 = arith.extf %91 : vector<8x128xbf16> to vector<8x128xf32>
    %93 = arith.truncf %84 : vector<8x32xf32> to vector<8x32xbf16>
    %c0_29 = arith.constant 0 : index
    %c0_30 = arith.constant 0 : index
    %94 = vector.load %arg2[%c0_29, %c0_30] : memref<32x128xbf16, #tpu.memory_space<vmem>>, vector<32x128xbf16>
    %cst_31 = arith.constant dense<0.000000e+00> : vector<8x128xf32>
    %95 = tpu.matmul %93, %94, %cst_31 {dimension_numbers = #tpu.dot_dimension_numbers<[1], [0], [0], [1], [0, 0, 1, 1], [], []>} : vector<8x32xbf16>, vector<32x128xbf16>, vector<8x128xf32> -> vector<8x128xf32>
    %96 = arith.addf %92, %95 : vector<8x128xf32>
    %97 = vector.extract_strided_slice %96 {offsets = [0, 0], sizes = [8, 96], strides = [1, 1]} : vector<8x128xf32> to vector<8x96xf32>
    %98 = arith.negf %97 : vector<8x96xf32>
    %99 = math.exp %98 : vector<8x96xf32>
    %cst_32 = arith.constant 1.000000e+00 : f32
    %100 = vector.broadcast %cst_32 : f32 to vector<8x96xf32>
    %101 = arith.addf %100, %99 : vector<8x96xf32>
    %102 = arith.divf %100, %101 : vector<8x96xf32>
    %103 = vector.extract_strided_slice %102 {offsets = [0, 0], sizes = [8, 32], strides = [1, 1]} : vector<8x96xf32> to vector<8x32xf32>
    %104 = vector.extract_strided_slice %102 {offsets = [0, 32], sizes = [8, 32], strides = [1, 1]} : vector<8x96xf32> to vector<8x32xf32>
    %105 = vector.extract_strided_slice %102 {offsets = [0, 64], sizes = [8, 32], strides = [1, 1]} : vector<8x96xf32> to vector<8x32xf32>
    %106 = vector.extract_strided_slice %96 {offsets = [0, 96], sizes = [8, 32], strides = [1, 1]} : vector<8x128xf32> to vector<8x32xf32>
    %107 = math.tanh %106 : vector<8x32xf32>
    %108 = arith.mulf %104, %82 : vector<8x32xf32>
    %109 = arith.mulf %103, %107 : vector<8x32xf32>
    %110 = arith.addf %108, %109 : vector<8x32xf32>
    %111 = math.tanh %110 : vector<8x32xf32>
    %112 = arith.mulf %105, %111 : vector<8x32xf32>
    %c8_i32_33 = arith.constant 8 : i32
    %113 = arith.muli %c3_i32, %c8_i32_33 : i32
    %114 = tpu.assume_multiple %113, 8 : i32
    %115 = arith.index_cast %114 : i32 to index
    %c0_34 = arith.constant 0 : index
    %116 = vector.load %arg6[%115, %c0_34] : memref<64x32xf32, #tpu.memory_space<vmem>>, vector<8x32xf32>
    tpu.vector_store %arg6[%115, %c0_34], %112 {strides = array<i32>} : memref<64x32xf32, #tpu.memory_space<vmem>>, vector<8x32xf32>,
    %c4_i32 = arith.constant 4 : i32
    %117 = arith.index_cast %c4_i32 : i32 to index
    %c0_35 = arith.constant 0 : index
    %c0_36 = arith.constant 0 : index
    %118 = vector.load %arg1[%117, %c0_35, %c0_36] : memref<8x8x128xbf16, #tpu.memory_space<vmem>>, vector<1x8x128xbf16>
    %119 = vector.shape_cast %118 : vector<1x8x128xbf16> to vector<8x128xbf16>
    %120 = arith.extf %119 : vector<8x128xbf16> to vector<8x128xf32>
    %121 = arith.truncf %112 : vector<8x32xf32> to vector<8x32xbf16>
    %c0_37 = arith.constant 0 : index
    %c0_38 = arith.constant 0 : index
    %122 = vector.load %arg2[%c0_37, %c0_38] : memref<32x128xbf16, #tpu.memory_space<vmem>>, vector<32x128xbf16>
    %cst_39 = arith.constant dense<0.000000e+00> : vector<8x128xf32>
    %123 = tpu.matmul %121, %122, %cst_39 {dimension_numbers = #tpu.dot_dimension_numbers<[1], [0], [0], [1], [0, 0, 1, 1], [], []>} : vector<8x32xbf16>, vector<32x128xbf16>, vector<8x128xf32> -> vector<8x128xf32>
    %124 = arith.addf %120, %123 : vector<8x128xf32>
    %125 = vector.extract_strided_slice %124 {offsets = [0, 0], sizes = [8, 96], strides = [1, 1]} : vector<8x128xf32> to vector<8x96xf32>
    %126 = arith.negf %125 : vector<8x96xf32>
    %127 = math.exp %126 : vector<8x96xf32>
    %cst_40 = arith.constant 1.000000e+00 : f32
    %128 = vector.broadcast %cst_40 : f32 to vector<8x96xf32>
    %129 = arith.addf %128, %127 : vector<8x96xf32>
    %130 = arith.divf %128, %129 : vector<8x96xf32>
    %131 = vector.extract_strided_slice %130 {offsets = [0, 0], sizes = [8, 32], strides = [1, 1]} : vector<8x96xf32> to vector<8x32xf32>
    %132 = vector.extract_strided_slice %130 {offsets = [0, 32], sizes = [8, 32], strides = [1, 1]} : vector<8x96xf32> to vector<8x32xf32>
    %133 = vector.extract_strided_slice %130 {offsets = [0, 64], sizes = [8, 32], strides = [1, 1]} : vector<8x96xf32> to vector<8x32xf32>
    %134 = vector.extract_strided_slice %124 {offsets = [0, 96], sizes = [8, 32], strides = [1, 1]} : vector<8x128xf32> to vector<8x32xf32>
    %135 = math.tanh %134 : vector<8x32xf32>
    %136 = arith.mulf %132, %110 : vector<8x32xf32>
    %137 = arith.mulf %131, %135 : vector<8x32xf32>
    %138 = arith.addf %136, %137 : vector<8x32xf32>
    %139 = math.tanh %138 : vector<8x32xf32>
    %140 = arith.mulf %133, %139 : vector<8x32xf32>
    %c8_i32_41 = arith.constant 8 : i32
    %141 = arith.muli %c4_i32, %c8_i32_41 : i32
    %142 = tpu.assume_multiple %141, 8 : i32
    %143 = arith.index_cast %142 : i32 to index
    %c0_42 = arith.constant 0 : index
    %144 = vector.load %arg6[%143, %c0_42] : memref<64x32xf32, #tpu.memory_space<vmem>>, vector<8x32xf32>
    tpu.vector_store %arg6[%143, %c0_42], %140 {strides = array<i32>} : memref<64x32xf32, #tpu.memory_space<vmem>>, vector<8x32xf32>,
    %c5_i32 = arith.constant 5 : i32
    %145 = arith.index_cast %c5_i32 : i32 to index
    %c0_43 = arith.constant 0 : index
    %c0_44 = arith.constant 0 : index
    %146 = vector.load %arg1[%145, %c0_43, %c0_44] : memref<8x8x128xbf16, #tpu.memory_space<vmem>>, vector<1x8x128xbf16>
    %147 = vector.shape_cast %146 : vector<1x8x128xbf16> to vector<8x128xbf16>
    %148 = arith.extf %147 : vector<8x128xbf16> to vector<8x128xf32>
    %149 = arith.truncf %140 : vector<8x32xf32> to vector<8x32xbf16>
    %c0_45 = arith.constant 0 : index
    %c0_46 = arith.constant 0 : index
    %150 = vector.load %arg2[%c0_45, %c0_46] : memref<32x128xbf16, #tpu.memory_space<vmem>>, vector<32x128xbf16>
    %cst_47 = arith.constant dense<0.000000e+00> : vector<8x128xf32>
    %151 = tpu.matmul %149, %150, %cst_47 {dimension_numbers = #tpu.dot_dimension_numbers<[1], [0], [0], [1], [0, 0, 1, 1], [], []>} : vector<8x32xbf16>, vector<32x128xbf16>, vector<8x128xf32> -> vector<8x128xf32>
    %152 = arith.addf %148, %151 : vector<8x128xf32>
    %153 = vector.extract_strided_slice %152 {offsets = [0, 0], sizes = [8, 96], strides = [1, 1]} : vector<8x128xf32> to vector<8x96xf32>
    %154 = arith.negf %153 : vector<8x96xf32>
    %155 = math.exp %154 : vector<8x96xf32>
    %cst_48 = arith.constant 1.000000e+00 : f32
    %156 = vector.broadcast %cst_48 : f32 to vector<8x96xf32>
    %157 = arith.addf %156, %155 : vector<8x96xf32>
    %158 = arith.divf %156, %157 : vector<8x96xf32>
    %159 = vector.extract_strided_slice %158 {offsets = [0, 0], sizes = [8, 32], strides = [1, 1]} : vector<8x96xf32> to vector<8x32xf32>
    %160 = vector.extract_strided_slice %158 {offsets = [0, 32], sizes = [8, 32], strides = [1, 1]} : vector<8x96xf32> to vector<8x32xf32>
    %161 = vector.extract_strided_slice %158 {offsets = [0, 64], sizes = [8, 32], strides = [1, 1]} : vector<8x96xf32> to vector<8x32xf32>
    %162 = vector.extract_strided_slice %152 {offsets = [0, 96], sizes = [8, 32], strides = [1, 1]} : vector<8x128xf32> to vector<8x32xf32>
    %163 = math.tanh %162 : vector<8x32xf32>
    %164 = arith.mulf %160, %138 : vector<8x32xf32>
    %165 = arith.mulf %159, %163 : vector<8x32xf32>
    %166 = arith.addf %164, %165 : vector<8x32xf32>
    %167 = math.tanh %166 : vector<8x32xf32>
    %168 = arith.mulf %161, %167 : vector<8x32xf32>
    %c8_i32_49 = arith.constant 8 : i32
    %169 = arith.muli %c5_i32, %c8_i32_49 : i32
    %170 = tpu.assume_multiple %169, 8 : i32
    %171 = arith.index_cast %170 : i32 to index
    %c0_50 = arith.constant 0 : index
    %172 = vector.load %arg6[%171, %c0_50] : memref<64x32xf32, #tpu.memory_space<vmem>>, vector<8x32xf32>
    tpu.vector_store %arg6[%171, %c0_50], %168 {strides = array<i32>} : memref<64x32xf32, #tpu.memory_space<vmem>>, vector<8x32xf32>,
    %c6_i32 = arith.constant 6 : i32
    %173 = arith.index_cast %c6_i32 : i32 to index
    %c0_51 = arith.constant 0 : index
    %c0_52 = arith.constant 0 : index
    %174 = vector.load %arg1[%173, %c0_51, %c0_52] : memref<8x8x128xbf16, #tpu.memory_space<vmem>>, vector<1x8x128xbf16>
    %175 = vector.shape_cast %174 : vector<1x8x128xbf16> to vector<8x128xbf16>
    %176 = arith.extf %175 : vector<8x128xbf16> to vector<8x128xf32>
    %177 = arith.truncf %168 : vector<8x32xf32> to vector<8x32xbf16>
    %c0_53 = arith.constant 0 : index
    %c0_54 = arith.constant 0 : index
    %178 = vector.load %arg2[%c0_53, %c0_54] : memref<32x128xbf16, #tpu.memory_space<vmem>>, vector<32x128xbf16>
    %cst_55 = arith.constant dense<0.000000e+00> : vector<8x128xf32>
    %179 = tpu.matmul %177, %178, %cst_55 {dimension_numbers = #tpu.dot_dimension_numbers<[1], [0], [0], [1], [0, 0, 1, 1], [], []>} : vector<8x32xbf16>, vector<32x128xbf16>, vector<8x128xf32> -> vector<8x128xf32>
    %180 = arith.addf %176, %179 : vector<8x128xf32>
    %181 = vector.extract_strided_slice %180 {offsets = [0, 0], sizes = [8, 96], strides = [1, 1]} : vector<8x128xf32> to vector<8x96xf32>
    %182 = arith.negf %181 : vector<8x96xf32>
    %183 = math.exp %182 : vector<8x96xf32>
    %cst_56 = arith.constant 1.000000e+00 : f32
    %184 = vector.broadcast %cst_56 : f32 to vector<8x96xf32>
    %185 = arith.addf %184, %183 : vector<8x96xf32>
    %186 = arith.divf %184, %185 : vector<8x96xf32>
    %187 = vector.extract_strided_slice %186 {offsets = [0, 0], sizes = [8, 32], strides = [1, 1]} : vector<8x96xf32> to vector<8x32xf32>
    %188 = vector.extract_strided_slice %186 {offsets = [0, 32], sizes = [8, 32], strides = [1, 1]} : vector<8x96xf32> to vector<8x32xf32>
    %189 = vector.extract_strided_slice %186 {offsets = [0, 64], sizes = [8, 32], strides = [1, 1]} : vector<8x96xf32> to vector<8x32xf32>
    %190 = vector.extract_strided_slice %180 {offsets = [0, 96], sizes = [8, 32], strides = [1, 1]} : vector<8x128xf32> to vector<8x32xf32>
    %191 = math.tanh %190 : vector<8x32xf32>
    %192 = arith.mulf %188, %166 : vector<8x32xf32>
    %193 = arith.mulf %187, %191 : vector<8x32xf32>
    %194 = arith.addf %192, %193 : vector<8x32xf32>
    %195 = math.tanh %194 : vector<8x32xf32>
    %196 = arith.mulf %189, %195 : vector<8x32xf32>
    %c8_i32_57 = arith.constant 8 : i32
    %197 = arith.muli %c6_i32, %c8_i32_57 : i32
    %198 = tpu.assume_multiple %197, 8 : i32
    %199 = arith.index_cast %198 : i32 to index
    %c0_58 = arith.constant 0 : index
    %200 = vector.load %arg6[%199, %c0_58] : memref<64x32xf32, #tpu.memory_space<vmem>>, vector<8x32xf32>
    tpu.vector_store %arg6[%199, %c0_58], %196 {strides = array<i32>} : memref<64x32xf32, #tpu.memory_space<vmem>>, vector<8x32xf32>,
    %c7_i32 = arith.constant 7 : i32
    %201 = arith.index_cast %c7_i32 : i32 to index
    %c0_59 = arith.constant 0 : index
    %c0_60 = arith.constant 0 : index
    %202 = vector.load %arg1[%201, %c0_59, %c0_60] : memref<8x8x128xbf16, #tpu.memory_space<vmem>>, vector<1x8x128xbf16>
    %203 = vector.shape_cast %202 : vector<1x8x128xbf16> to vector<8x128xbf16>
    %204 = arith.extf %203 : vector<8x128xbf16> to vector<8x128xf32>
    %205 = arith.truncf %196 : vector<8x32xf32> to vector<8x32xbf16>
    %c0_61 = arith.constant 0 : index
    %c0_62 = arith.constant 0 : index
    %206 = vector.load %arg2[%c0_61, %c0_62] : memref<32x128xbf16, #tpu.memory_space<vmem>>, vector<32x128xbf16>
    %cst_63 = arith.constant dense<0.000000e+00> : vector<8x128xf32>
    %207 = tpu.matmul %205, %206, %cst_63 {dimension_numbers = #tpu.dot_dimension_numbers<[1], [0], [0], [1], [0, 0, 1, 1], [], []>} : vector<8x32xbf16>, vector<32x128xbf16>, vector<8x128xf32> -> vector<8x128xf32>
    %208 = arith.addf %204, %207 : vector<8x128xf32>
    %209 = vector.extract_strided_slice %208 {offsets = [0, 0], sizes = [8, 96], strides = [1, 1]} : vector<8x128xf32> to vector<8x96xf32>
    %210 = arith.negf %209 : vector<8x96xf32>
    %211 = math.exp %210 : vector<8x96xf32>
    %cst_64 = arith.constant 1.000000e+00 : f32
    %212 = vector.broadcast %cst_64 : f32 to vector<8x96xf32>
    %213 = arith.addf %212, %211 : vector<8x96xf32>
    %214 = arith.divf %212, %213 : vector<8x96xf32>
    %215 = vector.extract_strided_slice %214 {offsets = [0, 0], sizes = [8, 32], strides = [1, 1]} : vector<8x96xf32> to vector<8x32xf32>
    %216 = vector.extract_strided_slice %214 {offsets = [0, 32], sizes = [8, 32], strides = [1, 1]} : vector<8x96xf32> to vector<8x32xf32>
    %217 = vector.extract_strided_slice %214 {offsets = [0, 64], sizes = [8, 32], strides = [1, 1]} : vector<8x96xf32> to vector<8x32xf32>
    %218 = vector.extract_strided_slice %208 {offsets = [0, 96], sizes = [8, 32], strides = [1, 1]} : vector<8x128xf32> to vector<8x32xf32>
    %219 = math.tanh %218 : vector<8x32xf32>
    %220 = arith.mulf %216, %194 : vector<8x32xf32>
    %221 = arith.mulf %215, %219 : vector<8x32xf32>
    %222 = arith.addf %220, %221 : vector<8x32xf32>
    %223 = math.tanh %222 : vector<8x32xf32>
    %224 = arith.mulf %217, %223 : vector<8x32xf32>
    %c8_i32_65 = arith.constant 8 : i32
    %225 = arith.muli %c7_i32, %c8_i32_65 : i32
    %226 = tpu.assume_multiple %225, 8 : i32
    %227 = arith.index_cast %226 : i32 to index
    %c0_66 = arith.constant 0 : index
    %228 = vector.load %arg6[%227, %c0_66] : memref<64x32xf32, #tpu.memory_space<vmem>>, vector<8x32xf32>
    tpu.vector_store %arg6[%227, %c0_66], %224 {strides = array<i32>} : memref<64x32xf32, #tpu.memory_space<vmem>>, vector<8x32xf32>,
    %c8_i32_67 = arith.constant 8 : i32
    %c0_68 = arith.constant 0 : index
    %c0_69 = arith.constant 0 : index
    %229 = vector.load %arg4[%c0_68, %c0_69] : memref<8x32xf32, #tpu.memory_space<vmem>>, vector<8x32xf32>
    tpu.vector_store %arg4[%c0_68, %c0_69], %224 {strides = array<i32>} : memref<8x32xf32, #tpu.memory_space<vmem>>, vector<8x32xf32>,
    %c0_70 = arith.constant 0 : index
    %c0_71 = arith.constant 0 : index
    %230 = vector.load %arg5[%c0_70, %c0_71] : memref<8x32xf32, #tpu.memory_space<vmem>>, vector<8x32xf32>
    tpu.vector_store %arg5[%c0_70, %c0_71], %222 {strides = array<i32>} : memref<8x32xf32, #tpu.memory_space<vmem>>, vector<8x32xf32>,
    %c0_72 = arith.constant 0 : index
    %c0_73 = arith.constant 0 : index
    %231 = vector.load %arg6[%c0_72, %c0_73] : memref<64x32xf32, #tpu.memory_space<vmem>>, vector<64x32xf32>
    %232 = arith.truncf %231 : vector<64x32xf32> to vector<64x32xbf16>
    %c0_74 = arith.constant 0 : index
    %c0_75 = arith.constant 0 : index
    %233 = vector.load %arg3[%c0_74, %c0_75] : memref<64x32xbf16, #tpu.memory_space<vmem>>, vector<64x32xbf16>
    tpu.vector_store %arg3[%c0_74, %c0_75], %232 {strides = array<i32>} : memref<64x32xbf16, #tpu.memory_space<vmem>>, vector<64x32xbf16>,
    return
  }
  func.func @transform_0(%arg0: i32) -> (i32, i32, i32) {
    %c0_i32 = arith.constant 0 : i32
    %c0_i32_0 = arith.constant 0 : i32
    %c0_i32_1 = arith.constant 0 : i32
    return %arg0, %c0_i32, %c0_i32_0 : i32, i32, i32
  }
  func.func @transform_1(%arg0: i32) -> (i32, i32) {
    %c0_i32 = arith.constant 0 : i32
    %c0_i32_0 = arith.constant 0 : i32
    %c0_i32_1 = arith.constant 0 : i32
    return %c0_i32, %c0_i32_0 : i32, i32
  }
  func.func @transform_2(%arg0: i32) -> (i32, i32) {
    %c0_i32 = arith.constant 0 : i32
    %c0_i32_0 = arith.constant 0 : i32
    return %arg0, %c0_i32 : i32, i32
  }
}

module attributes {stable_mosaic.version = 11 : i64} {
  func.func @_matmul_bias_kernel(%arg0: i32, %arg1: memref<64x32xbf16, #tpu.memory_space<vmem>>, %arg2: memref<32x128xbf16, #tpu.memory_space<vmem>>, %arg3: memref<1x128xf32, #tpu.memory_space<vmem>>, %arg4: memref<64x128xbf16, #tpu.memory_space<vmem>>) attributes {dimension_semantics = [#tpu.dimension_semantics<parallel>], iteration_bounds = array<i64: 1>, scalar_prefetch = 0 : i64, scratch_operands = 0 : i64, tpu.core_type = #tpu.core_type<tc>, window_params = [{transform_indices = @transform_0, window_bounds = array<i64: 64, 32>}, {pipeline_mode = #tpu.pipeline_mode<synchronous>, transform_indices = @transform_1, window_bounds = array<i64: 32, 128>}, {pipeline_mode = #tpu.pipeline_mode<synchronous>, transform_indices = @transform_2, window_bounds = array<i64: 1, 128>}, {transform_indices = @transform_3, window_bounds = array<i64: 64, 128>}]} {
    %c0 = arith.constant 0 : index
    %c0_0 = arith.constant 0 : index
    %0 = vector.load %arg1[%c0, %c0_0] : memref<64x32xbf16, #tpu.memory_space<vmem>>, vector<64x32xbf16>
    %c0_1 = arith.constant 0 : index
    %c0_2 = arith.constant 0 : index
    %1 = vector.load %arg2[%c0_1, %c0_2] : memref<32x128xbf16, #tpu.memory_space<vmem>>, vector<32x128xbf16>
    %cst = arith.constant dense<0.000000e+00> : vector<64x128xf32>
    %2 = tpu.matmul %0, %1, %cst {dimension_numbers = #tpu.dot_dimension_numbers<[1], [0], [0], [1], [0, 0, 1, 1], [], []>} : vector<64x32xbf16>, vector<32x128xbf16>, vector<64x128xf32> -> vector<64x128xf32>
    %c0_3 = arith.constant 0 : index
    %c0_4 = arith.constant 0 : index
    %3 = vector.load %arg3[%c0_3, %c0_4] : memref<1x128xf32, #tpu.memory_space<vmem>>, vector<1x128xf32>
    %4 = vector.broadcast %3 : vector<1x128xf32> to vector<64x128xf32>
    %5 = arith.addf %2, %4 : vector<64x128xf32>
    %6 = arith.truncf %5 : vector<64x128xf32> to vector<64x128xbf16>
    %c0_5 = arith.constant 0 : index
    %c0_6 = arith.constant 0 : index
    %7 = vector.load %arg4[%c0_5, %c0_6] : memref<64x128xbf16, #tpu.memory_space<vmem>>, vector<64x128xbf16>
    tpu.vector_store %arg4[%c0_5, %c0_6], %6 {strides = array<i32>} : memref<64x128xbf16, #tpu.memory_space<vmem>>, vector<64x128xbf16>,
    return
  }
  func.func @transform_0(%arg0: i32) -> (i32, i32) {
    %c0_i32 = arith.constant 0 : i32
    %c0_i32_0 = arith.constant 0 : i32
    return %arg0, %c0_i32 : i32, i32
  }
  func.func @transform_1(%arg0: i32) -> (i32, i32) {
    %c0_i32 = arith.constant 0 : i32
    %c0_i32_0 = arith.constant 0 : i32
    %c0_i32_1 = arith.constant 0 : i32
    return %c0_i32, %c0_i32_0 : i32, i32
  }
  func.func @transform_2(%arg0: i32) -> (i32, i32) {
    %c0_i32 = arith.constant 0 : i32
    %c0_i32_0 = arith.constant 0 : i32
    %c0_i32_1 = arith.constant 0 : i32
    return %c0_i32, %c0_i32_0 : i32, i32
  }
  func.func @transform_3(%arg0: i32) -> (i32, i32) {
    %c0_i32 = arith.constant 0 : i32
    %c0_i32_0 = arith.constant 0 : i32
    return %arg0, %c0_i32 : i32, i32
  }
}

module attributes {stable_mosaic.version = 11 : i64} {
  func.func @_lstm_chunk_kernel(%arg0: i32, %arg1: memref<8x8x128xbf16, #tpu.memory_space<vmem>>, %arg2: memref<32x128xbf16, #tpu.memory_space<vmem>>, %arg3: memref<32x128xbf16, #tpu.memory_space<vmem>>, %arg4: memref<1x128xf32, #tpu.memory_space<vmem>>, %arg5: memref<64x128xf32, #tpu.memory_space<vmem>>, %arg6: memref<8x32xf32, #tpu.memory_space<vmem>>, %arg7: memref<8x32xf32, #tpu.memory_space<vmem>>, %arg8: memref<64x32xf32, #tpu.memory_space<vmem>>) attributes {dimension_semantics = [#tpu.dimension_semantics<arbitrary>], iteration_bounds = array<i64: 1>, scalar_prefetch = 0 : i64, scratch_operands = 3 : i64, tpu.core_type = #tpu.core_type<tc>, window_params = [{transform_indices = @transform_0, window_bounds = array<i64: 8, 8, 128>}, {pipeline_mode = #tpu.pipeline_mode<synchronous>, transform_indices = @transform_1, window_bounds = array<i64: 32, 128>}, {pipeline_mode = #tpu.pipeline_mode<synchronous>, transform_indices = @transform_2, window_bounds = array<i64: 32, 128>}, {pipeline_mode = #tpu.pipeline_mode<synchronous>, transform_indices = @transform_3, window_bounds = array<i64: 1, 128>}, {transform_indices = @transform_4, window_bounds = array<i64: 64, 128>}]} {
    %c0_i32 = arith.constant 0 : i32
    %0 = arith.cmpi eq, %arg0, %c0_i32 : i32
    %1 = arith.extui %0 : i1 to i32
    %c0_i32_0 = arith.constant 0 : i32
    %2 = arith.cmpi ne, %1, %c0_i32_0 : i32
    scf.if %2 {
      %cst_81 = arith.constant 0.000000e+00 : f32
      %239 = vector.broadcast %cst_81 : f32 to vector<8x32xf32>
      %c0_82 = arith.constant 0 : index
      %c0_83 = arith.constant 0 : index
      %240 = vector.load %arg6[%c0_82, %c0_83] : memref<8x32xf32, #tpu.memory_space<vmem>>, vector<8x32xf32>
      tpu.vector_store %arg6[%c0_82, %c0_83], %239 {strides = array<i32>} : memref<8x32xf32, #tpu.memory_space<vmem>>, vector<8x32xf32>,
      %cst_84 = arith.constant 0.000000e+00 : f32
      %241 = vector.broadcast %cst_84 : f32 to vector<8x32xf32>
      %c0_85 = arith.constant 0 : index
      %c0_86 = arith.constant 0 : index
      %242 = vector.load %arg7[%c0_85, %c0_86] : memref<8x32xf32, #tpu.memory_space<vmem>>, vector<8x32xf32>
      tpu.vector_store %arg7[%c0_85, %c0_86], %241 {strides = array<i32>} : memref<8x32xf32, #tpu.memory_space<vmem>>, vector<8x32xf32>,
    } else {
    }
    %c0 = arith.constant 0 : index
    %c0_1 = arith.constant 0 : index
    %3 = vector.load %arg6[%c0, %c0_1] : memref<8x32xf32, #tpu.memory_space<vmem>>, vector<8x32xf32>
    %c0_2 = arith.constant 0 : index
    %c0_3 = arith.constant 0 : index
    %4 = vector.load %arg7[%c0_2, %c0_3] : memref<8x32xf32, #tpu.memory_space<vmem>>, vector<8x32xf32>
    %c0_i32_4 = arith.constant 0 : i32
    %5 = arith.index_cast %c0_i32_4 : i32 to index
    %c0_5 = arith.constant 0 : index
    %c0_6 = arith.constant 0 : index
    %6 = vector.load %arg1[%5, %c0_5, %c0_6] : memref<8x8x128xbf16, #tpu.memory_space<vmem>>, vector<1x8x128xbf16>
    %7 = vector.shape_cast %6 : vector<1x8x128xbf16> to vector<8x128xbf16>
    %8 = arith.extf %7 : vector<8x128xbf16> to vector<8x128xf32>
    %9 = arith.truncf %3 : vector<8x32xf32> to vector<8x32xbf16>
    %c0_7 = arith.constant 0 : index
    %c0_8 = arith.constant 0 : index
    %10 = vector.load %arg2[%c0_7, %c0_8] : memref<32x128xbf16, #tpu.memory_space<vmem>>, vector<32x128xbf16>
    %cst = arith.constant dense<0.000000e+00> : vector<8x128xf32>
    %11 = tpu.matmul %9, %10, %cst {dimension_numbers = #tpu.dot_dimension_numbers<[1], [0], [0], [1], [0, 0, 1, 1], [], []>} : vector<8x32xbf16>, vector<32x128xbf16>, vector<8x128xf32> -> vector<8x128xf32>
    %12 = arith.addf %8, %11 : vector<8x128xf32>
    %13 = vector.extract_strided_slice %12 {offsets = [0, 0], sizes = [8, 96], strides = [1, 1]} : vector<8x128xf32> to vector<8x96xf32>
    %14 = arith.negf %13 : vector<8x96xf32>
    %15 = math.exp %14 : vector<8x96xf32>
    %cst_9 = arith.constant 1.000000e+00 : f32
    %16 = vector.broadcast %cst_9 : f32 to vector<8x96xf32>
    %17 = arith.addf %16, %15 : vector<8x96xf32>
    %18 = arith.divf %16, %17 : vector<8x96xf32>
    %19 = vector.extract_strided_slice %18 {offsets = [0, 0], sizes = [8, 32], strides = [1, 1]} : vector<8x96xf32> to vector<8x32xf32>
    %20 = vector.extract_strided_slice %18 {offsets = [0, 32], sizes = [8, 32], strides = [1, 1]} : vector<8x96xf32> to vector<8x32xf32>
    %21 = vector.extract_strided_slice %18 {offsets = [0, 64], sizes = [8, 32], strides = [1, 1]} : vector<8x96xf32> to vector<8x32xf32>
    %22 = vector.extract_strided_slice %12 {offsets = [0, 96], sizes = [8, 32], strides = [1, 1]} : vector<8x128xf32> to vector<8x32xf32>
    %23 = math.tanh %22 : vector<8x32xf32>
    %24 = arith.mulf %20, %4 : vector<8x32xf32>
    %25 = arith.mulf %19, %23 : vector<8x32xf32>
    %26 = arith.addf %24, %25 : vector<8x32xf32>
    %27 = math.tanh %26 : vector<8x32xf32>
    %28 = arith.mulf %21, %27 : vector<8x32xf32>
    %c8_i32 = arith.constant 8 : i32
    %29 = arith.muli %c0_i32_4, %c8_i32 : i32
    %30 = tpu.assume_multiple %29, 8 : i32
    %31 = arith.index_cast %30 : i32 to index
    %c0_10 = arith.constant 0 : index
    %32 = vector.load %arg8[%31, %c0_10] : memref<64x32xf32, #tpu.memory_space<vmem>>, vector<8x32xf32>
    tpu.vector_store %arg8[%31, %c0_10], %28 {strides = array<i32>} : memref<64x32xf32, #tpu.memory_space<vmem>>, vector<8x32xf32>,
    %c1_i32 = arith.constant 1 : i32
    %33 = arith.index_cast %c1_i32 : i32 to index
    %c0_11 = arith.constant 0 : index
    %c0_12 = arith.constant 0 : index
    %34 = vector.load %arg1[%33, %c0_11, %c0_12] : memref<8x8x128xbf16, #tpu.memory_space<vmem>>, vector<1x8x128xbf16>
    %35 = vector.shape_cast %34 : vector<1x8x128xbf16> to vector<8x128xbf16>
    %36 = arith.extf %35 : vector<8x128xbf16> to vector<8x128xf32>
    %37 = arith.truncf %28 : vector<8x32xf32> to vector<8x32xbf16>
    %c0_13 = arith.constant 0 : index
    %c0_14 = arith.constant 0 : index
    %38 = vector.load %arg2[%c0_13, %c0_14] : memref<32x128xbf16, #tpu.memory_space<vmem>>, vector<32x128xbf16>
    %cst_15 = arith.constant dense<0.000000e+00> : vector<8x128xf32>
    %39 = tpu.matmul %37, %38, %cst_15 {dimension_numbers = #tpu.dot_dimension_numbers<[1], [0], [0], [1], [0, 0, 1, 1], [], []>} : vector<8x32xbf16>, vector<32x128xbf16>, vector<8x128xf32> -> vector<8x128xf32>
    %40 = arith.addf %36, %39 : vector<8x128xf32>
    %41 = vector.extract_strided_slice %40 {offsets = [0, 0], sizes = [8, 96], strides = [1, 1]} : vector<8x128xf32> to vector<8x96xf32>
    %42 = arith.negf %41 : vector<8x96xf32>
    %43 = math.exp %42 : vector<8x96xf32>
    %cst_16 = arith.constant 1.000000e+00 : f32
    %44 = vector.broadcast %cst_16 : f32 to vector<8x96xf32>
    %45 = arith.addf %44, %43 : vector<8x96xf32>
    %46 = arith.divf %44, %45 : vector<8x96xf32>
    %47 = vector.extract_strided_slice %46 {offsets = [0, 0], sizes = [8, 32], strides = [1, 1]} : vector<8x96xf32> to vector<8x32xf32>
    %48 = vector.extract_strided_slice %46 {offsets = [0, 32], sizes = [8, 32], strides = [1, 1]} : vector<8x96xf32> to vector<8x32xf32>
    %49 = vector.extract_strided_slice %46 {offsets = [0, 64], sizes = [8, 32], strides = [1, 1]} : vector<8x96xf32> to vector<8x32xf32>
    %50 = vector.extract_strided_slice %40 {offsets = [0, 96], sizes = [8, 32], strides = [1, 1]} : vector<8x128xf32> to vector<8x32xf32>
    %51 = math.tanh %50 : vector<8x32xf32>
    %52 = arith.mulf %48, %26 : vector<8x32xf32>
    %53 = arith.mulf %47, %51 : vector<8x32xf32>
    %54 = arith.addf %52, %53 : vector<8x32xf32>
    %55 = math.tanh %54 : vector<8x32xf32>
    %56 = arith.mulf %49, %55 : vector<8x32xf32>
    %c8_i32_17 = arith.constant 8 : i32
    %57 = arith.muli %c1_i32, %c8_i32_17 : i32
    %58 = tpu.assume_multiple %57, 8 : i32
    %59 = arith.index_cast %58 : i32 to index
    %c0_18 = arith.constant 0 : index
    %60 = vector.load %arg8[%59, %c0_18] : memref<64x32xf32, #tpu.memory_space<vmem>>, vector<8x32xf32>
    tpu.vector_store %arg8[%59, %c0_18], %56 {strides = array<i32>} : memref<64x32xf32, #tpu.memory_space<vmem>>, vector<8x32xf32>,
    %c2_i32 = arith.constant 2 : i32
    %61 = arith.index_cast %c2_i32 : i32 to index
    %c0_19 = arith.constant 0 : index
    %c0_20 = arith.constant 0 : index
    %62 = vector.load %arg1[%61, %c0_19, %c0_20] : memref<8x8x128xbf16, #tpu.memory_space<vmem>>, vector<1x8x128xbf16>
    %63 = vector.shape_cast %62 : vector<1x8x128xbf16> to vector<8x128xbf16>
    %64 = arith.extf %63 : vector<8x128xbf16> to vector<8x128xf32>
    %65 = arith.truncf %56 : vector<8x32xf32> to vector<8x32xbf16>
    %c0_21 = arith.constant 0 : index
    %c0_22 = arith.constant 0 : index
    %66 = vector.load %arg2[%c0_21, %c0_22] : memref<32x128xbf16, #tpu.memory_space<vmem>>, vector<32x128xbf16>
    %cst_23 = arith.constant dense<0.000000e+00> : vector<8x128xf32>
    %67 = tpu.matmul %65, %66, %cst_23 {dimension_numbers = #tpu.dot_dimension_numbers<[1], [0], [0], [1], [0, 0, 1, 1], [], []>} : vector<8x32xbf16>, vector<32x128xbf16>, vector<8x128xf32> -> vector<8x128xf32>
    %68 = arith.addf %64, %67 : vector<8x128xf32>
    %69 = vector.extract_strided_slice %68 {offsets = [0, 0], sizes = [8, 96], strides = [1, 1]} : vector<8x128xf32> to vector<8x96xf32>
    %70 = arith.negf %69 : vector<8x96xf32>
    %71 = math.exp %70 : vector<8x96xf32>
    %cst_24 = arith.constant 1.000000e+00 : f32
    %72 = vector.broadcast %cst_24 : f32 to vector<8x96xf32>
    %73 = arith.addf %72, %71 : vector<8x96xf32>
    %74 = arith.divf %72, %73 : vector<8x96xf32>
    %75 = vector.extract_strided_slice %74 {offsets = [0, 0], sizes = [8, 32], strides = [1, 1]} : vector<8x96xf32> to vector<8x32xf32>
    %76 = vector.extract_strided_slice %74 {offsets = [0, 32], sizes = [8, 32], strides = [1, 1]} : vector<8x96xf32> to vector<8x32xf32>
    %77 = vector.extract_strided_slice %74 {offsets = [0, 64], sizes = [8, 32], strides = [1, 1]} : vector<8x96xf32> to vector<8x32xf32>
    %78 = vector.extract_strided_slice %68 {offsets = [0, 96], sizes = [8, 32], strides = [1, 1]} : vector<8x128xf32> to vector<8x32xf32>
    %79 = math.tanh %78 : vector<8x32xf32>
    %80 = arith.mulf %76, %54 : vector<8x32xf32>
    %81 = arith.mulf %75, %79 : vector<8x32xf32>
    %82 = arith.addf %80, %81 : vector<8x32xf32>
    %83 = math.tanh %82 : vector<8x32xf32>
    %84 = arith.mulf %77, %83 : vector<8x32xf32>
    %c8_i32_25 = arith.constant 8 : i32
    %85 = arith.muli %c2_i32, %c8_i32_25 : i32
    %86 = tpu.assume_multiple %85, 8 : i32
    %87 = arith.index_cast %86 : i32 to index
    %c0_26 = arith.constant 0 : index
    %88 = vector.load %arg8[%87, %c0_26] : memref<64x32xf32, #tpu.memory_space<vmem>>, vector<8x32xf32>
    tpu.vector_store %arg8[%87, %c0_26], %84 {strides = array<i32>} : memref<64x32xf32, #tpu.memory_space<vmem>>, vector<8x32xf32>,
    %c3_i32 = arith.constant 3 : i32
    %89 = arith.index_cast %c3_i32 : i32 to index
    %c0_27 = arith.constant 0 : index
    %c0_28 = arith.constant 0 : index
    %90 = vector.load %arg1[%89, %c0_27, %c0_28] : memref<8x8x128xbf16, #tpu.memory_space<vmem>>, vector<1x8x128xbf16>
    %91 = vector.shape_cast %90 : vector<1x8x128xbf16> to vector<8x128xbf16>
    %92 = arith.extf %91 : vector<8x128xbf16> to vector<8x128xf32>
    %93 = arith.truncf %84 : vector<8x32xf32> to vector<8x32xbf16>
    %c0_29 = arith.constant 0 : index
    %c0_30 = arith.constant 0 : index
    %94 = vector.load %arg2[%c0_29, %c0_30] : memref<32x128xbf16, #tpu.memory_space<vmem>>, vector<32x128xbf16>
    %cst_31 = arith.constant dense<0.000000e+00> : vector<8x128xf32>
    %95 = tpu.matmul %93, %94, %cst_31 {dimension_numbers = #tpu.dot_dimension_numbers<[1], [0], [0], [1], [0, 0, 1, 1], [], []>} : vector<8x32xbf16>, vector<32x128xbf16>, vector<8x128xf32> -> vector<8x128xf32>
    %96 = arith.addf %92, %95 : vector<8x128xf32>
    %97 = vector.extract_strided_slice %96 {offsets = [0, 0], sizes = [8, 96], strides = [1, 1]} : vector<8x128xf32> to vector<8x96xf32>
    %98 = arith.negf %97 : vector<8x96xf32>
    %99 = math.exp %98 : vector<8x96xf32>
    %cst_32 = arith.constant 1.000000e+00 : f32
    %100 = vector.broadcast %cst_32 : f32 to vector<8x96xf32>
    %101 = arith.addf %100, %99 : vector<8x96xf32>
    %102 = arith.divf %100, %101 : vector<8x96xf32>
    %103 = vector.extract_strided_slice %102 {offsets = [0, 0], sizes = [8, 32], strides = [1, 1]} : vector<8x96xf32> to vector<8x32xf32>
    %104 = vector.extract_strided_slice %102 {offsets = [0, 32], sizes = [8, 32], strides = [1, 1]} : vector<8x96xf32> to vector<8x32xf32>
    %105 = vector.extract_strided_slice %102 {offsets = [0, 64], sizes = [8, 32], strides = [1, 1]} : vector<8x96xf32> to vector<8x32xf32>
    %106 = vector.extract_strided_slice %96 {offsets = [0, 96], sizes = [8, 32], strides = [1, 1]} : vector<8x128xf32> to vector<8x32xf32>
    %107 = math.tanh %106 : vector<8x32xf32>
    %108 = arith.mulf %104, %82 : vector<8x32xf32>
    %109 = arith.mulf %103, %107 : vector<8x32xf32>
    %110 = arith.addf %108, %109 : vector<8x32xf32>
    %111 = math.tanh %110 : vector<8x32xf32>
    %112 = arith.mulf %105, %111 : vector<8x32xf32>
    %c8_i32_33 = arith.constant 8 : i32
    %113 = arith.muli %c3_i32, %c8_i32_33 : i32
    %114 = tpu.assume_multiple %113, 8 : i32
    %115 = arith.index_cast %114 : i32 to index
    %c0_34 = arith.constant 0 : index
    %116 = vector.load %arg8[%115, %c0_34] : memref<64x32xf32, #tpu.memory_space<vmem>>, vector<8x32xf32>
    tpu.vector_store %arg8[%115, %c0_34], %112 {strides = array<i32>} : memref<64x32xf32, #tpu.memory_space<vmem>>, vector<8x32xf32>,
    %c4_i32 = arith.constant 4 : i32
    %117 = arith.index_cast %c4_i32 : i32 to index
    %c0_35 = arith.constant 0 : index
    %c0_36 = arith.constant 0 : index
    %118 = vector.load %arg1[%117, %c0_35, %c0_36] : memref<8x8x128xbf16, #tpu.memory_space<vmem>>, vector<1x8x128xbf16>
    %119 = vector.shape_cast %118 : vector<1x8x128xbf16> to vector<8x128xbf16>
    %120 = arith.extf %119 : vector<8x128xbf16> to vector<8x128xf32>
    %121 = arith.truncf %112 : vector<8x32xf32> to vector<8x32xbf16>
    %c0_37 = arith.constant 0 : index
    %c0_38 = arith.constant 0 : index
    %122 = vector.load %arg2[%c0_37, %c0_38] : memref<32x128xbf16, #tpu.memory_space<vmem>>, vector<32x128xbf16>
    %cst_39 = arith.constant dense<0.000000e+00> : vector<8x128xf32>
    %123 = tpu.matmul %121, %122, %cst_39 {dimension_numbers = #tpu.dot_dimension_numbers<[1], [0], [0], [1], [0, 0, 1, 1], [], []>} : vector<8x32xbf16>, vector<32x128xbf16>, vector<8x128xf32> -> vector<8x128xf32>
    %124 = arith.addf %120, %123 : vector<8x128xf32>
    %125 = vector.extract_strided_slice %124 {offsets = [0, 0], sizes = [8, 96], strides = [1, 1]} : vector<8x128xf32> to vector<8x96xf32>
    %126 = arith.negf %125 : vector<8x96xf32>
    %127 = math.exp %126 : vector<8x96xf32>
    %cst_40 = arith.constant 1.000000e+00 : f32
    %128 = vector.broadcast %cst_40 : f32 to vector<8x96xf32>
    %129 = arith.addf %128, %127 : vector<8x96xf32>
    %130 = arith.divf %128, %129 : vector<8x96xf32>
    %131 = vector.extract_strided_slice %130 {offsets = [0, 0], sizes = [8, 32], strides = [1, 1]} : vector<8x96xf32> to vector<8x32xf32>
    %132 = vector.extract_strided_slice %130 {offsets = [0, 32], sizes = [8, 32], strides = [1, 1]} : vector<8x96xf32> to vector<8x32xf32>
    %133 = vector.extract_strided_slice %130 {offsets = [0, 64], sizes = [8, 32], strides = [1, 1]} : vector<8x96xf32> to vector<8x32xf32>
    %134 = vector.extract_strided_slice %124 {offsets = [0, 96], sizes = [8, 32], strides = [1, 1]} : vector<8x128xf32> to vector<8x32xf32>
    %135 = math.tanh %134 : vector<8x32xf32>
    %136 = arith.mulf %132, %110 : vector<8x32xf32>
    %137 = arith.mulf %131, %135 : vector<8x32xf32>
    %138 = arith.addf %136, %137 : vector<8x32xf32>
    %139 = math.tanh %138 : vector<8x32xf32>
    %140 = arith.mulf %133, %139 : vector<8x32xf32>
    %c8_i32_41 = arith.constant 8 : i32
    %141 = arith.muli %c4_i32, %c8_i32_41 : i32
    %142 = tpu.assume_multiple %141, 8 : i32
    %143 = arith.index_cast %142 : i32 to index
    %c0_42 = arith.constant 0 : index
    %144 = vector.load %arg8[%143, %c0_42] : memref<64x32xf32, #tpu.memory_space<vmem>>, vector<8x32xf32>
    tpu.vector_store %arg8[%143, %c0_42], %140 {strides = array<i32>} : memref<64x32xf32, #tpu.memory_space<vmem>>, vector<8x32xf32>,
    %c5_i32 = arith.constant 5 : i32
    %145 = arith.index_cast %c5_i32 : i32 to index
    %c0_43 = arith.constant 0 : index
    %c0_44 = arith.constant 0 : index
    %146 = vector.load %arg1[%145, %c0_43, %c0_44] : memref<8x8x128xbf16, #tpu.memory_space<vmem>>, vector<1x8x128xbf16>
    %147 = vector.shape_cast %146 : vector<1x8x128xbf16> to vector<8x128xbf16>
    %148 = arith.extf %147 : vector<8x128xbf16> to vector<8x128xf32>
    %149 = arith.truncf %140 : vector<8x32xf32> to vector<8x32xbf16>
    %c0_45 = arith.constant 0 : index
    %c0_46 = arith.constant 0 : index
    %150 = vector.load %arg2[%c0_45, %c0_46] : memref<32x128xbf16, #tpu.memory_space<vmem>>, vector<32x128xbf16>
    %cst_47 = arith.constant dense<0.000000e+00> : vector<8x128xf32>
    %151 = tpu.matmul %149, %150, %cst_47 {dimension_numbers = #tpu.dot_dimension_numbers<[1], [0], [0], [1], [0, 0, 1, 1], [], []>} : vector<8x32xbf16>, vector<32x128xbf16>, vector<8x128xf32> -> vector<8x128xf32>
    %152 = arith.addf %148, %151 : vector<8x128xf32>
    %153 = vector.extract_strided_slice %152 {offsets = [0, 0], sizes = [8, 96], strides = [1, 1]} : vector<8x128xf32> to vector<8x96xf32>
    %154 = arith.negf %153 : vector<8x96xf32>
    %155 = math.exp %154 : vector<8x96xf32>
    %cst_48 = arith.constant 1.000000e+00 : f32
    %156 = vector.broadcast %cst_48 : f32 to vector<8x96xf32>
    %157 = arith.addf %156, %155 : vector<8x96xf32>
    %158 = arith.divf %156, %157 : vector<8x96xf32>
    %159 = vector.extract_strided_slice %158 {offsets = [0, 0], sizes = [8, 32], strides = [1, 1]} : vector<8x96xf32> to vector<8x32xf32>
    %160 = vector.extract_strided_slice %158 {offsets = [0, 32], sizes = [8, 32], strides = [1, 1]} : vector<8x96xf32> to vector<8x32xf32>
    %161 = vector.extract_strided_slice %158 {offsets = [0, 64], sizes = [8, 32], strides = [1, 1]} : vector<8x96xf32> to vector<8x32xf32>
    %162 = vector.extract_strided_slice %152 {offsets = [0, 96], sizes = [8, 32], strides = [1, 1]} : vector<8x128xf32> to vector<8x32xf32>
    %163 = math.tanh %162 : vector<8x32xf32>
    %164 = arith.mulf %160, %138 : vector<8x32xf32>
    %165 = arith.mulf %159, %163 : vector<8x32xf32>
    %166 = arith.addf %164, %165 : vector<8x32xf32>
    %167 = math.tanh %166 : vector<8x32xf32>
    %168 = arith.mulf %161, %167 : vector<8x32xf32>
    %c8_i32_49 = arith.constant 8 : i32
    %169 = arith.muli %c5_i32, %c8_i32_49 : i32
    %170 = tpu.assume_multiple %169, 8 : i32
    %171 = arith.index_cast %170 : i32 to index
    %c0_50 = arith.constant 0 : index
    %172 = vector.load %arg8[%171, %c0_50] : memref<64x32xf32, #tpu.memory_space<vmem>>, vector<8x32xf32>
    tpu.vector_store %arg8[%171, %c0_50], %168 {strides = array<i32>} : memref<64x32xf32, #tpu.memory_space<vmem>>, vector<8x32xf32>,
    %c6_i32 = arith.constant 6 : i32
    %173 = arith.index_cast %c6_i32 : i32 to index
    %c0_51 = arith.constant 0 : index
    %c0_52 = arith.constant 0 : index
    %174 = vector.load %arg1[%173, %c0_51, %c0_52] : memref<8x8x128xbf16, #tpu.memory_space<vmem>>, vector<1x8x128xbf16>
    %175 = vector.shape_cast %174 : vector<1x8x128xbf16> to vector<8x128xbf16>
    %176 = arith.extf %175 : vector<8x128xbf16> to vector<8x128xf32>
    %177 = arith.truncf %168 : vector<8x32xf32> to vector<8x32xbf16>
    %c0_53 = arith.constant 0 : index
    %c0_54 = arith.constant 0 : index
    %178 = vector.load %arg2[%c0_53, %c0_54] : memref<32x128xbf16, #tpu.memory_space<vmem>>, vector<32x128xbf16>
    %cst_55 = arith.constant dense<0.000000e+00> : vector<8x128xf32>
    %179 = tpu.matmul %177, %178, %cst_55 {dimension_numbers = #tpu.dot_dimension_numbers<[1], [0], [0], [1], [0, 0, 1, 1], [], []>} : vector<8x32xbf16>, vector<32x128xbf16>, vector<8x128xf32> -> vector<8x128xf32>
    %180 = arith.addf %176, %179 : vector<8x128xf32>
    %181 = vector.extract_strided_slice %180 {offsets = [0, 0], sizes = [8, 96], strides = [1, 1]} : vector<8x128xf32> to vector<8x96xf32>
    %182 = arith.negf %181 : vector<8x96xf32>
    %183 = math.exp %182 : vector<8x96xf32>
    %cst_56 = arith.constant 1.000000e+00 : f32
    %184 = vector.broadcast %cst_56 : f32 to vector<8x96xf32>
    %185 = arith.addf %184, %183 : vector<8x96xf32>
    %186 = arith.divf %184, %185 : vector<8x96xf32>
    %187 = vector.extract_strided_slice %186 {offsets = [0, 0], sizes = [8, 32], strides = [1, 1]} : vector<8x96xf32> to vector<8x32xf32>
    %188 = vector.extract_strided_slice %186 {offsets = [0, 32], sizes = [8, 32], strides = [1, 1]} : vector<8x96xf32> to vector<8x32xf32>
    %189 = vector.extract_strided_slice %186 {offsets = [0, 64], sizes = [8, 32], strides = [1, 1]} : vector<8x96xf32> to vector<8x32xf32>
    %190 = vector.extract_strided_slice %180 {offsets = [0, 96], sizes = [8, 32], strides = [1, 1]} : vector<8x128xf32> to vector<8x32xf32>
    %191 = math.tanh %190 : vector<8x32xf32>
    %192 = arith.mulf %188, %166 : vector<8x32xf32>
    %193 = arith.mulf %187, %191 : vector<8x32xf32>
    %194 = arith.addf %192, %193 : vector<8x32xf32>
    %195 = math.tanh %194 : vector<8x32xf32>
    %196 = arith.mulf %189, %195 : vector<8x32xf32>
    %c8_i32_57 = arith.constant 8 : i32
    %197 = arith.muli %c6_i32, %c8_i32_57 : i32
    %198 = tpu.assume_multiple %197, 8 : i32
    %199 = arith.index_cast %198 : i32 to index
    %c0_58 = arith.constant 0 : index
    %200 = vector.load %arg8[%199, %c0_58] : memref<64x32xf32, #tpu.memory_space<vmem>>, vector<8x32xf32>
    tpu.vector_store %arg8[%199, %c0_58], %196 {strides = array<i32>} : memref<64x32xf32, #tpu.memory_space<vmem>>, vector<8x32xf32>,
    %c7_i32 = arith.constant 7 : i32
    %201 = arith.index_cast %c7_i32 : i32 to index
    %c0_59 = arith.constant 0 : index
    %c0_60 = arith.constant 0 : index
    %202 = vector.load %arg1[%201, %c0_59, %c0_60] : memref<8x8x128xbf16, #tpu.memory_space<vmem>>, vector<1x8x128xbf16>
    %203 = vector.shape_cast %202 : vector<1x8x128xbf16> to vector<8x128xbf16>
    %204 = arith.extf %203 : vector<8x128xbf16> to vector<8x128xf32>
    %205 = arith.truncf %196 : vector<8x32xf32> to vector<8x32xbf16>
    %c0_61 = arith.constant 0 : index
    %c0_62 = arith.constant 0 : index
    %206 = vector.load %arg2[%c0_61, %c0_62] : memref<32x128xbf16, #tpu.memory_space<vmem>>, vector<32x128xbf16>
    %cst_63 = arith.constant dense<0.000000e+00> : vector<8x128xf32>
    %207 = tpu.matmul %205, %206, %cst_63 {dimension_numbers = #tpu.dot_dimension_numbers<[1], [0], [0], [1], [0, 0, 1, 1], [], []>} : vector<8x32xbf16>, vector<32x128xbf16>, vector<8x128xf32> -> vector<8x128xf32>
    %208 = arith.addf %204, %207 : vector<8x128xf32>
    %209 = vector.extract_strided_slice %208 {offsets = [0, 0], sizes = [8, 96], strides = [1, 1]} : vector<8x128xf32> to vector<8x96xf32>
    %210 = arith.negf %209 : vector<8x96xf32>
    %211 = math.exp %210 : vector<8x96xf32>
    %cst_64 = arith.constant 1.000000e+00 : f32
    %212 = vector.broadcast %cst_64 : f32 to vector<8x96xf32>
    %213 = arith.addf %212, %211 : vector<8x96xf32>
    %214 = arith.divf %212, %213 : vector<8x96xf32>
    %215 = vector.extract_strided_slice %214 {offsets = [0, 0], sizes = [8, 32], strides = [1, 1]} : vector<8x96xf32> to vector<8x32xf32>
    %216 = vector.extract_strided_slice %214 {offsets = [0, 32], sizes = [8, 32], strides = [1, 1]} : vector<8x96xf32> to vector<8x32xf32>
    %217 = vector.extract_strided_slice %214 {offsets = [0, 64], sizes = [8, 32], strides = [1, 1]} : vector<8x96xf32> to vector<8x32xf32>
    %218 = vector.extract_strided_slice %208 {offsets = [0, 96], sizes = [8, 32], strides = [1, 1]} : vector<8x128xf32> to vector<8x32xf32>
    %219 = math.tanh %218 : vector<8x32xf32>
    %220 = arith.mulf %216, %194 : vector<8x32xf32>
    %221 = arith.mulf %215, %219 : vector<8x32xf32>
    %222 = arith.addf %220, %221 : vector<8x32xf32>
    %223 = math.tanh %222 : vector<8x32xf32>
    %224 = arith.mulf %217, %223 : vector<8x32xf32>
    %c8_i32_65 = arith.constant 8 : i32
    %225 = arith.muli %c7_i32, %c8_i32_65 : i32
    %226 = tpu.assume_multiple %225, 8 : i32
    %227 = arith.index_cast %226 : i32 to index
    %c0_66 = arith.constant 0 : index
    %228 = vector.load %arg8[%227, %c0_66] : memref<64x32xf32, #tpu.memory_space<vmem>>, vector<8x32xf32>
    tpu.vector_store %arg8[%227, %c0_66], %224 {strides = array<i32>} : memref<64x32xf32, #tpu.memory_space<vmem>>, vector<8x32xf32>,
    %c8_i32_67 = arith.constant 8 : i32
    %c0_68 = arith.constant 0 : index
    %c0_69 = arith.constant 0 : index
    %229 = vector.load %arg6[%c0_68, %c0_69] : memref<8x32xf32, #tpu.memory_space<vmem>>, vector<8x32xf32>
    tpu.vector_store %arg6[%c0_68, %c0_69], %224 {strides = array<i32>} : memref<8x32xf32, #tpu.memory_space<vmem>>, vector<8x32xf32>,
    %c0_70 = arith.constant 0 : index
    %c0_71 = arith.constant 0 : index
    %230 = vector.load %arg7[%c0_70, %c0_71] : memref<8x32xf32, #tpu.memory_space<vmem>>, vector<8x32xf32>
    tpu.vector_store %arg7[%c0_70, %c0_71], %222 {strides = array<i32>} : memref<8x32xf32, #tpu.memory_space<vmem>>, vector<8x32xf32>,
    %c0_72 = arith.constant 0 : index
    %c0_73 = arith.constant 0 : index
    %231 = vector.load %arg8[%c0_72, %c0_73] : memref<64x32xf32, #tpu.memory_space<vmem>>, vector<64x32xf32>
    %232 = arith.truncf %231 : vector<64x32xf32> to vector<64x32xbf16>
    %c0_74 = arith.constant 0 : index
    %c0_75 = arith.constant 0 : index
    %233 = vector.load %arg3[%c0_74, %c0_75] : memref<32x128xbf16, #tpu.memory_space<vmem>>, vector<32x128xbf16>
    %cst_76 = arith.constant dense<0.000000e+00> : vector<64x128xf32>
    %234 = tpu.matmul %232, %233, %cst_76 {dimension_numbers = #tpu.dot_dimension_numbers<[1], [0], [0], [1], [0, 0, 1, 1], [], []>} : vector<64x32xbf16>, vector<32x128xbf16>, vector<64x128xf32> -> vector<64x128xf32>
    %c0_77 = arith.constant 0 : index
    %c0_78 = arith.constant 0 : index
    %235 = vector.load %arg4[%c0_77, %c0_78] : memref<1x128xf32, #tpu.memory_space<vmem>>, vector<1x128xf32>
    %236 = vector.broadcast %235 : vector<1x128xf32> to vector<64x128xf32>
    %237 = arith.addf %234, %236 : vector<64x128xf32>
    %c0_79 = arith.constant 0 : index
    %c0_80 = arith.constant 0 : index
    %238 = vector.load %arg5[%c0_79, %c0_80] : memref<64x128xf32, #tpu.memory_space<vmem>>, vector<64x128xf32>
    tpu.vector_store %arg5[%c0_79, %c0_80], %237 {strides = array<i32>} : memref<64x128xf32, #tpu.memory_space<vmem>>, vector<64x128xf32>,
    return
  }
  func.func @transform_0(%arg0: i32) -> (i32, i32, i32) {
    %c0_i32 = arith.constant 0 : i32
    %c0_i32_0 = arith.constant 0 : i32
    %c0_i32_1 = arith.constant 0 : i32
    return %arg0, %c0_i32, %c0_i32_0 : i32, i32, i32
  }
  func.func @transform_1(%arg0: i32) -> (i32, i32) {
    %c0_i32 = arith.constant 0 : i32
    %c0_i32_0 = arith.constant 0 : i32
    %c0_i32_1 = arith.constant 0 : i32
    return %c0_i32, %c0_i32_0 : i32, i32
  }
  func.func @transform_2(%arg0: i32) -> (i32, i32) {
    %c0_i32 = arith.constant 0 : i32
    %c0_i32_0 = arith.constant 0 : i32
    %c0_i32_1 = arith.constant 0 : i32
    return %c0_i32, %c0_i32_0 : i32, i32
  }
  func.func @transform_3(%arg0: i32) -> (i32, i32) {
    %c0_i32 = arith.constant 0 : i32
    %c0_i32_0 = arith.constant 0 : i32
    %c0_i32_1 = arith.constant 0 : i32
    return %c0_i32, %c0_i32_0 : i32, i32
  }
  func.func @transform_4(%arg0: i32) -> (i32, i32) {
    %c0_i32 = arith.constant 0 : i32
    %c0_i32_0 = arith.constant 0 : i32
    return %arg0, %c0_i32 : i32, i32
  }
}

</mosaic_0001>

<bundles_post_ra>
// kernel: lstm_seq2seq_forward.4
= control target key start
LH: loop header
LB: loop body
LE: loop exit
PB: predicated region body
PF: predicated region fallthrough
CT: control target
= control target key end

     0   :  { %s414_s1 = inlined_call_operand.vmem [shape: bf16[128,128], index: 1, kind: input, shape index: {}]   ;;  %s415_s0 = inlined_call_operand.vmem [shape: bf16[64,128], index: 0, kind: input, shape index: {}]   ;;  %s416_s2 = inlined_call_operand.vmem [shape: f32[1,128], index: 2, kind: input, shape index: {}]   ;;  %s417_s3 = inlined_call_operand.vmem [shape: bf16[64,128], index: 3, kind: output, shape index: {}]  }
   0x1   :  { %v331_v0 = vld [vmem:[%s414_s1 + $0x38] sm:$0xff]   ;;  %v332_v1 = vld [vmem:[%s414_s1 + $0x30] sm:$0xff]   ;;  %v333_v2 = vld [vmem:[%s414_s1 + $0x28] sm:$0xff]  }
   0x2   :  { %291 = vmatprep.subr.bf16.mxu0 %v331_v0  ;;  %315 = vmatprep.subr.bf16.mxu1 %v331_v0  ;;  %v334_v3 = vld [vmem:[%s414_s1 + $0x20] sm:$0xff]   ;;  %v340_v5 = vld [vmem:[%s415_s0 + $0x10] sm:$0xff]   ;;  %v335_v6 = vld [vmem:[%s414_s1 + $0x18] sm:$0xff]  }
   0x3   :  { %292 = vmatpush3.bf16.msra.mxu0 %v331_v0  ;;  %323 = vmatpush3.bf16.msra.mxu1 %v331_v0  ;;  %v339_v4 = vld [vmem:[%s415_s0] sm:$0xff]   ;;  %v336_v7 = vld [vmem:[%s414_s1 + $0x10] sm:$0xff]   ;;  %v337_v8 = vld [vmem:[%s414_s1 + $0x8] sm:$0xff]  }
   0x4   :  { %293 = vmatprep.subr.bf16.mxu0 %v332_v1  ;;  %316 = vmatprep.subr.bf16.mxu1 %v332_v1  ;;  %v338_v9 = vld [vmem:[%s414_s1] sm:$0xff]   ;;  %v341_v10 = vld [vmem:[%s415_s0 + $0x8] sm:$0xff]   ;;  %v342_v11 = vld [vmem:[%s415_s0 + $0x18] sm:$0xff]  }
   0x5   :  { %307 = vmatprep.mubr.bf16.mxu0 %v339_v4  ;;  %311 = vmatprep.mubr.bf16.mxu1 %v340_v5  ;;  %v227_v14 = vld [vmem:[%s416_s2] ss:$0 sm:$0xff] }
   0x7   :  { %294 = vmatpush3.bf16.msra.mxu0 %v332_v1  ;;  %324 = vmatpush3.bf16.msra.mxu1 %v332_v1 }
   0x8   :  { %295 = vmatprep.subr.bf16.mxu0 %v333_v2  ;;  %317 = vmatprep.subr.bf16.mxu1 %v333_v2 }
   0xb   :  { %296 = vmatpush3.bf16.msra.mxu0 %v333_v2  ;;  %325 = vmatpush3.bf16.msra.mxu1 %v333_v2 }
   0xc   :  { %297 = vmatprep.subr.bf16.mxu0 %v334_v3  ;;  %318 = vmatprep.subr.bf16.mxu1 %v334_v3 }
   0xf   :  { %298 = vmatpush3.bf16.msra.mxu0 %v334_v3  ;;  %326 = vmatpush3.bf16.msra.mxu1 %v334_v3 }
  0x10   :  { %299 = vmatprep.subr.bf16.mxu0 %v335_v6  ;;  %319 = vmatprep.subr.bf16.mxu1 %v335_v6 }
  0x13   :  { %300 = vmatpush3.bf16.msra.mxu0 %v335_v6  ;;  %327 = vmatpush3.bf16.msra.mxu1 %v335_v6 }
  0x14   :  { %301 = vmatprep.subr.bf16.mxu0 %v336_v7  ;;  %320 = vmatprep.subr.bf16.mxu1 %v336_v7 }
  0x17   :  { %302 = vmatpush3.bf16.msra.mxu0 %v336_v7  ;;  %328 = vmatpush3.bf16.msra.mxu1 %v336_v7 }
  0x18   :  { %303 = vmatprep.subr.bf16.mxu0 %v337_v8  ;;  %321 = vmatprep.subr.bf16.mxu1 %v337_v8 }
  0x1b   :  { %304 = vmatpush3.bf16.msra.mxu0 %v337_v8  ;;  %329 = vmatpush3.bf16.msra.mxu1 %v337_v8 }
  0x1c   :  { %305 = vmatprep.subr.bf16.mxu0 %v338_v9  ;;  %322 = vmatprep.subr.bf16.mxu1 %v338_v9 }
  0x1f   :  { %306 = vmatpush3.bf16.msra.mxu0 %v338_v9  ;;  %330 = vmatpush3.bf16.msra.mxu1 %v338_v9 }
  0x22   :  { %308 = vmatmul.mubr.bf16.vlgmr.msra.gmra.mxu0 %v341_v10  ;;  %312 = vmatmul.mubr.bf16.vlgmr.msra.gmra.mxu1 %v342_v11 }
  0xe2   :  { %v309_v12 = vpop.f32.mrf.mxu0  ;;  %v313_v13 = vpop.f32.mrf.mxu1 }
  0xe3   :  { %v161_v19 = vadd.f32 %v309_v12, %v227_v14  ;;  %v177_v20 = vadd.f32 %v313_v13, %v227_v14 }
  0xe4   :  { %v152_v15 = vpop.f32.mrf.mxu0  ;;  %v168_v16 = vpop.f32.mrf.mxu1 }
  0xe5   :  { %v153_v23 = vadd.f32 %v227_v14, %v152_v15  ;;  %v169_v24 = vadd.f32 %v227_v14, %v168_v16 }
  0xe6   :  { %v310_v17 = vpop.f32.mrf.mxu0  ;;  %v314_v18 = vpop.f32.mrf.mxu1 }
  0xe7   :  { %v164_v21 = vadd.f32 %v310_v17, %v227_v14  ;;  %v180_v22 = vadd.f32 %v314_v18, %v227_v14 }
  0xe8   :  { %v155_v25 = vpop.f32.mrf.mxu0  ;;  %v171_v26 = vpop.f32.mrf.mxu1 }
  0xe9   :  { %v264_v27 = vpack.c.bf16 %v164_v21, %v161_v19  ;;  %v274_v28 = vpack.c.bf16 %v180_v22, %v177_v20  ;;  %v156_v29 = vadd.f32 %v227_v14, %v155_v25  ;;  %v172_v30 = vadd.f32 %v227_v14, %v171_v26 }
  0xeb   :  { %276 = vst [vmem:[%s417_s3 + $0x8] sm:$0xff] %v264_v27   ;;  %278 = vst [vmem:[%s417_s3 + $0x18] sm:$0xff] %v274_v28   ;;  %v259_v31 = vpack.c.bf16 %v156_v29, %v153_v23  ;;  %v269_v32 = vpack.c.bf16 %v172_v30, %v169_v24 }
  0xed   :  { %260 = vst [vmem:[%s417_s3] sm:$0xff] %v259_v31   ;;  %277 = vst [vmem:[%s417_s3 + $0x10] sm:$0xff] %v269_v32  }

// kernel: lstm_seq2seq_forward.6
= control target key start
LH: loop header
LB: loop body
LE: loop exit
PB: predicated region body
PF: predicated region fallthrough
CT: control target
= control target key end

     0   :  { %vm66_vm0 = vcmask 261120   ;;  %s319_s1 = inlined_call_operand.vmem [shape: bf16[32,128], index: 1, kind: input, shape index: {}]   ;;  %s320_s0 = inlined_call_operand.vmem [shape: bf16[64,32], index: 0, kind: input, shape index: {}]   ;;  %s321_s2 = inlined_call_operand.vmem [shape: f32[1,128], index: 2, kind: input, shape index: {}]   ;;  %s322_s3 = inlined_call_operand.vmem [shape: bf16[64,128], index: 3, kind: output, shape index: {}]  }
   0x1   :  { %v260_v0 = vld [vmem:[%s319_s1 + $0x8] sm:$0xff]   ;;  %v261_v1 = vld [vmem:[%s319_s1] sm:$0xff]   ;;  %v263_v3 = vld [vmem:[%s320_s0 + $0x10] sm:$0xff]  }
   0x2   :  { %244 = vmatprep.subr.bf16.mxu0 %v260_v0  ;;  %256 = vmatprep.subr.bf16.mxu1 %v260_v0  ;;  %v262_v2 = vld [vmem:[%s320_s0] sm:$0xff]   ;;  %v264_v4 = vld [vmem:[%s320_s0 + $0x8] sm:$0xff]   ;;  %v265_v5 = vld [vmem:[%s320_s0 + $0x18] sm:$0xff]  }
   0x3   :  { %245 = vmatpush3.bf16.msra.mxu0 %v260_v0  ;;  %258 = vmatpush3.bf16.msra.mxu1 %v260_v0  ;;  %v188_v8 = vld [vmem:[%s321_s2] ss:$0 sm:$0xff] }
   0x4   :  { %246 = vmatprep.subr.bf16.mxu0 %v261_v1  ;;  %257 = vmatprep.subr.bf16.mxu1 %v261_v1 }
   0x5   :  { %248 = vmatprep.mubr.msk.bf16.mxu0 %vm66_vm0, %v262_v2  ;;  %252 = vmatprep.mubr.msk.bf16.mxu1 %vm66_vm0, %v263_v3 }
   0x7   :  { %247 = vmatpush3.bf16.msra.mxu0 %v261_v1  ;;  %259 = vmatpush3.bf16.msra.mxu1 %v261_v1 }
   0xa   :  { %249 = vmatmul.mubr.msk.bf16.vlgmr.msra.gmra.mxu0 %vm66_vm0, %v264_v4  ;;  %253 = vmatmul.mubr.msk.bf16.vlgmr.msra.gmra.mxu1 %vm66_vm0, %v265_v5 }
  0xca   :  { %v250_v6 = vpop.f32.mrf.mxu0  ;;  %v254_v7 = vpop.f32.mrf.mxu1 }
  0xcb   :  { %v122_v13 = vadd.f32 %v250_v6, %v188_v8  ;;  %v138_v14 = vadd.f32 %v254_v7, %v188_v8 }
  0xcc   :  { %v113_v9 = vpop.f32.mrf.mxu0  ;;  %v129_v10 = vpop.f32.mrf.mxu1 }
  0xcd   :  { %v114_v17 = vadd.f32 %v188_v8, %v113_v9  ;;  %v130_v18 = vadd.f32 %v188_v8, %v129_v10 }
  0xce   :  { %v251_v11 = vpop.f32.mrf.mxu0  ;;  %v255_v12 = vpop.f32.mrf.mxu1 }
  0xcf   :  { %v125_v15 = vadd.f32 %v251_v11, %v188_v8  ;;  %v141_v16 = vadd.f32 %v255_v12, %v188_v8 }
  0xd0   :  { %v116_v19 = vpop.f32.mrf.mxu0  ;;  %v132_v20 = vpop.f32.mrf.mxu1 }
  0xd1   :  { %v223_v21 = vpack.c.bf16 %v125_v15, %v122_v13  ;;  %v233_v22 = vpack.c.bf16 %v141_v16, %v138_v14  ;;  %v117_v23 = vadd.f32 %v188_v8, %v116_v19  ;;  %v133_v24 = vadd.f32 %v188_v8, %v132_v20 }
  0xd3   :  { %235 = vst [vmem:[%s322_s3 + $0x8] sm:$0xff] %v223_v21   ;;  %237 = vst [vmem:[%s322_s3 + $0x18] sm:$0xff] %v233_v22   ;;  %v218_v25 = vpack.c.bf16 %v117_v23, %v114_v17  ;;  %v228_v26 = vpack.c.bf16 %v133_v24, %v130_v18 }
  0xd5   :  { %219 = vst [vmem:[%s322_s3] sm:$0xff] %v218_v25   ;;  %236 = vst [vmem:[%s322_s3 + $0x10] sm:$0xff] %v228_v26  }

// kernel: lstm_seq2seq_forward.5
= control target key start
LH: loop header
LB: loop body
LE: loop exit
PB: predicated region body
PF: predicated region fallthrough
CT: control target
= control target key end

     0   :  { %vm16_vm0 = vcmask 261120   ;;  %v1084_v0 = vmov 0.0   ;;  %vm1085_vm1 = vmmov 0   ;;  %s1086_s15 = smov 32   ;;  %s1087_s20 = smov 64   ;;  %vm843_vm2 = vcmask 257024   ;;  %s1320_s1 = inlined_call_operand.vmem [shape: bf16[32,128], index: 1, kind: input, shape index: {}]   ;;  %s1321_s0 = inlined_call_operand.vmem [shape: bf16[8,8,128], index: 0, kind: input, shape index: {}]   ;;  %s1322_s2 = inlined_call_operand.vmem [shape: bf16[64,32], index: 2, kind: output, shape index: {}]  }
   0x1   :  { %935 = vmatprep.subr.bf16.mxu0 %v1084_v0  ;;  %v1004_v1 = vld [vmem:[%s1320_s1 + $0x8] sm:$0xff]   ;;  %939 = vmatprep.mubr.msk.bf16.mxu0 %vm1085_vm1, %v1084_v0  ;;  %17 = vst.msk [vmem:[#allocation2] sm:$0xff] %vm16_vm0, %v1084_v0  ;;  %18 = vst.msk [vmem:[#allocation3] sm:$0xff] %vm16_vm0, %v1084_v0  ;;  %v1005_v2 = vld [vmem:[%s1320_s1] sm:$0xff]  }
   0x2   :  { %943 = vmatprep.subr.bf16.mxu1 %v1084_v0  ;;  %947 = vmatprep.mubr.msk.bf16.mxu1 %vm1085_vm1, %v1084_v0  ;;  %v21_v5 = vld [vmem:[%s1321_s0] sm:$0xff]   ;;  %v1006_v24 = vld [vmem:[%s1320_s1 + $0x8] sm:$0xff]  }
   0x3   :  { %936 = vmatpush3.bf16.msra.mxu0 %v1004_v1  ;;  %v22_v6 = vunpack.c.l.bf16 %v21_v5  ;;  %944 = vmatpush3.bf16.msra.mxu1 %v1006_v24  ;;  %v1007_v25 = vld [vmem:[%s1320_s1] sm:$0xff]   ;;  %v120_v31 = vunpack.c.h.bf16 %v21_v5  ;;  %v1008_v47 = vld [vmem:[%s1320_s1 + $0x8] sm:$0xff]  }
   0x4   :  { %937 = vmatprep.subr.bf16.mxu0 %v1084_v0  ;;  %945 = vmatprep.subr.bf16.mxu1 %v1084_v0  ;;  %v1009_v48 = vld [vmem:[%s1320_s1] sm:$0xff]   ;;  %v865_v54 = vld [vmem:[%s1321_s0 + $0x8] sm:$0xff]  }
   0x5   :  { %v217_v55 = vunpack.c.l.bf16 %v865_v54 }
   0x7   :  { %938 = vmatpush3.bf16.msra.mxu0 %v1005_v2  ;;  %946 = vmatpush3.bf16.msra.mxu1 %v1007_v25 }
   0x8   :  { %v19_v3 = vld [vmem:[#allocation2] sm:$0xff]  ;;  %951 = vmatprep.subr.bf16.mxu0 %v1084_v0  ;;  %v20_v13 = vld [vmem:[#allocation3] sm:$0xff]  ;;  %959 = vmatprep.subr.bf16.mxu1 %v1084_v0 }
   0x9   :  { %v23_v4 = vpack.c.bf16 %v19_v3, %v19_v3 }
   0xb   :  { %940 = vmatmul.mubr.msk.bf16.vlgmr.msra.gmra.mxu0 %vm16_vm0, %v23_v4 }
   0xc   :  { %955 = vmatprep.mubr.msk.bf16.mxu0 %vm1085_vm1, %v1084_v0  ;;  %952 = vmatpush3.bf16.msra.mxu0 %v1008_v47 }
   0xd   :  { %953 = vmatprep.subr.bf16.mxu0 %v1084_v0 }
  0x10   :  { %954 = vmatpush3.bf16.msra.mxu0 %v1009_v48 }
  0x11   :  { %967 = vmatprep.subr.bf16.mxu0 %v1084_v0 }
  0xcb   :  { %v78_v7 = vpop.f32.mrf.mxu0 }
  0xcc   :  { %v84_v8 = vadd.f32 %v78_v7, %v22_v6 }
  0xcd   :  { %v941_v9 = vpop.f32.mrf.mxu0 }
  0xce   :  { %1020 = vtanh.f32 %v84_v8  ;;  %v859_v14 = vmul.f32 -1.442695, %v84_v8  ;;  %v1010_v8 = vld [vmem:[%s1320_s1 + $0x8] sm:$0xff]   ;;  %v1011_v9 = vld [vmem:[%s1320_s1] sm:$0xff]  }
  0xcf   :  { %v81_v10 = vpop.f32.mrf.mxu0 }
  0xd0   :  { %1022 = vpow2.f32 %v859_v14 }
  0xd1   :  { %v942_v11 = vpop.f32.mrf.mxu0 }
  0xdb   :  { %v1021_v12 = vpop.eup %1020 }
  0xdc   :  { %98 = vrot.lane.b32.xlu0 %v1021_v12, %s1086_s15 }
  0xdd   :  { %v1023_v15 = vpop.eup %1022 }
  0xde   :  { %v88_v16 = vadd.f32 1.0, %v1023_v15  ;;  %v314_v15 = vunpack.c.h.bf16 %v865_v54 }
  0xe0   :  { %93 = vrot.lane.b32.xlu0 %v20_v13, %s1086_s15  ;;  %1024 = vrcp.f32 %v88_v16 }
  0xed   :  { %v1025_v17 = vpop.eup %1024 }
 0x14e   :  { %v99_v18 = vpop.permute.xlu0 %98 }
 0x14f   :  { %v101_v19 = vmul.f32 %v1025_v17, %v99_v18 }
 0x151   :  { %103 = vrot.lane.b32.xlu1 %v101_v19, %s1086_s15 }
 0x152   :  { %v94_v20 = vpop.permute.xlu0 %93 }
 0x153   :  { %v96_v21 = vmul.f32 %v1025_v17, %v94_v20 }
 0x1c3   :  { %v104_v22 = vpop.permute.xlu1 %103 }
 0x1c4   :  { %v106_v23 = vadd.f32 %v104_v22, %v96_v21 }
 0x1c6   :  { %1026 = vtanh.f32 %v106_v23 }
 0x1d3   :  { %v1027_v26 = vpop.eup %1026 }
 0x1d4   :  { %109 = vrot.lane.b32.xlu1 %v1027_v26, %s1086_s15 }
 0x246   :  { %v110_v27 = vpop.permute.xlu1 %109 }
 0x247   :  { %v1140_v28 = vmul.f32 %v1025_v17, %v110_v27 }
 0x249   :  { %v121_v29 = vpack.c.bf16 %v1140_v28, %v1140_v28 }
 0x24b   :  { %127 = vrot.lane.b32.xlu0 %v121_v29, %s1087_s20 }
 0x2bd   :  { %v128_v30 = vpop.permute.xlu0 %127 }
 0x2be   :  { %948 = vmatmul.mubr.msk.bf16.vlgmr.msra.gmra.mxu1 %vm16_vm0, %v128_v30 }
 0x2bf   :  { %963 = vmatprep.mubr.msk.bf16.mxu1 %vm1085_vm1, %v1084_v0  ;;  %960 = vmatpush3.bf16.msra.mxu1 %v1010_v8 }
 0x2c0   :  { %961 = vmatprep.subr.bf16.mxu1 %v1084_v0 }
 0x2c3   :  { %962 = vmatpush3.bf16.msra.mxu1 %v1011_v9 }
 0x2c4   :  { %975 = vmatprep.subr.bf16.mxu1 %v1084_v0 }
 0x37e   :  { %v178_v32 = vpop.f32.mrf.mxu1 }
 0x37f   :  { %v184_v33 = vadd.f32 %v178_v32, %v120_v31  ;;  %v1012_v32 = vld [vmem:[%s1320_s1 + $0x8] sm:$0xff]  }
 0x380   :  { %v949_v34 = vpop.f32.mrf.mxu1 }
 0x381   :  { %1028 = vtanh.f32 %v184_v33  ;;  %v864_v38 = vmul.f32 -1.442695, %v184_v33  ;;  %v1013_v33 = vld [vmem:[%s1320_s1] sm:$0xff]  }
 0x382   :  { %v181_v35 = vpop.f32.mrf.mxu1 }
 0x383   :  { %1030 = vpow2.f32 %v864_v38 }
 0x384   :  { %v950_v36 = vpop.f32.mrf.mxu1 }
 0x38e   :  { %v1029_v37 = vpop.eup %1028 }
 0x38f   :  { %194 = vrot.lane.b32.xlu1 %v1029_v37, %s1086_s15 }
 0x390   :  { %v1031_v39 = vpop.eup %1030 }
 0x391   :  { %v188_v40 = vadd.f32 1.0, %v1031_v39  ;;  %v875_v39 = vld [vmem:[%s1321_s0 + $0x10] sm:$0xff]  }
 0x393   :  { %1032 = vrcp.f32 %v188_v40  ;;  %v411_v40 = vunpack.c.l.bf16 %v875_v39 }
 0x3a0   :  { %v1033_v41 = vpop.eup %1032 }
 0x3a1   :  { %v192_v44 = vmul.f32 %v1033_v41, %v106_v23 }
 0x401   :  { %v195_v42 = vpop.permute.xlu1 %194 }
 0x402   :  { %v197_v43 = vmul.f32 %v1033_v41, %v195_v42 }
 0x404   :  { %199 = vrot.lane.b32.xlu0 %v197_v43, %s1086_s15 }
 0x476   :  { %v200_v45 = vpop.permute.xlu0 %199 }
 0x477   :  { %v202_v46 = vadd.f32 %v200_v45, %v192_v44 }
 0x479   :  { %1034 = vtanh.f32 %v202_v46 }
 0x486   :  { %v1035_v49 = vpop.eup %1034 }
 0x487   :  { %205 = vrot.lane.b32.xlu1 %v1035_v49, %s1086_s15 }
 0x4f9   :  { %v206_v50 = vpop.permute.xlu1 %205 }
 0x4fa   :  { %v1159_v51 = vmul.f32 %v1033_v41, %v206_v50 }
 0x4fc   :  { %v218_v52 = vpack.c.bf16 %v1159_v51, %v1159_v51 }
 0x4fe   :  { %224 = vrot.lane.b32.xlu0 %v218_v52, %s1087_s20 }
 0x570   :  { %v225_v53 = vpop.permute.xlu0 %224 }
 0x571   :  { %956 = vmatmul.mubr.msk.bf16.vlgmr.msra.gmra.mxu0 %vm16_vm0, %v225_v53 }
 0x572   :  { %971 = vmatprep.mubr.msk.bf16.mxu0 %vm1085_vm1, %v1084_v0  ;;  %968 = vmatpush3.bf16.msra.mxu0 %v1012_v32 }
 0x573   :  { %969 = vmatprep.subr.bf16.mxu0 %v1084_v0 }
 0x576   :  { %970 = vmatpush3.bf16.msra.mxu0 %v1013_v33 }
 0x577   :  { %983 = vmatprep.subr.bf16.mxu0 %v1084_v0 }
 0x631   :  { %v275_v56 = vpop.f32.mrf.mxu0 }
 0x632   :  { %v281_v57 = vadd.f32 %v275_v56, %v217_v55 }
 0x633   :  { %v957_v58 = vpop.f32.mrf.mxu0 }
 0x634   :  { %1036 = vtanh.f32 %v281_v57  ;;  %v869_v62 = vmul.f32 -1.442695, %v281_v57  ;;  %v1014_v57 = vld [vmem:[%s1320_s1 + $0x8] sm:$0xff]   ;;  %v1015_v58 = vld [vmem:[%s1320_s1] sm:$0xff]  }
 0x635   :  { %v278_v59 = vpop.f32.mrf.mxu0 }
 0x636   :  { %1038 = vpow2.f32 %v869_v62 }
 0x637   :  { %v958_v60 = vpop.f32.mrf.mxu0 }
 0x641   :  { %v1037_v61 = vpop.eup %1036 }
 0x642   :  { %291 = vrot.lane.b32.xlu1 %v1037_v61, %s1086_s15 }
 0x643   :  { %v1039_v63 = vpop.eup %1038 }
 0x644   :  { %v285_v1 = vadd.f32 1.0, %v1039_v63 }
 0x646   :  { %1040 = vrcp.f32 %v285_v1  ;;  %v508_v1 = vunpack.c.h.bf16 %v875_v39 }
 0x653   :  { %v1041_v2 = vpop.eup %1040 }
 0x654   :  { %v289_v5 = vmul.f32 %v1041_v2, %v202_v46 }
 0x6b4   :  { %v292_v3 = vpop.permute.xlu1 %291 }
 0x6b5   :  { %v294_v4 = vmul.f32 %v1041_v2, %v292_v3 }
 0x6b7   :  { %296 = vrot.lane.b32.xlu0 %v294_v4, %s1086_s15 }
 0x729   :  { %v297_v6 = vpop.permute.xlu0 %296 }
 0x72a   :  { %v299_v7 = vadd.f32 %v297_v6, %v289_v5 }
 0x72c   :  { %1042 = vtanh.f32 %v299_v7 }
 0x739   :  { %v1043_v10 = vpop.eup %1042 }
 0x73a   :  { %302 = vrot.lane.b32.xlu1 %v1043_v10, %s1086_s15 }
 0x7ac   :  { %v303_v11 = vpop.permute.xlu1 %302 }
 0x7ad   :  { %v1181_v12 = vmul.f32 %v1041_v2, %v303_v11 }
 0x7af   :  { %v315_v13 = vpack.c.bf16 %v1181_v12, %v1181_v12 }
 0x7b1   :  { %321 = vrot.lane.b32.xlu0 %v315_v13, %s1087_s20 }
 0x823   :  { %v322_v14 = vpop.permute.xlu0 %321 }
 0x824   :  { %964 = vmatmul.mubr.msk.bf16.vlgmr.msra.gmra.mxu1 %vm16_vm0, %v322_v14 }
 0x825   :  { %979 = vmatprep.mubr.msk.bf16.mxu1 %vm1085_vm1, %v1084_v0  ;;  %976 = vmatpush3.bf16.msra.mxu1 %v1014_v57 }
 0x826   :  { %977 = vmatprep.subr.bf16.mxu1 %v1084_v0 }
 0x829   :  { %978 = vmatpush3.bf16.msra.mxu1 %v1015_v58 }
 0x82a   :  { %991 = vmatprep.subr.bf16.mxu1 %v1084_v0 }
 0x8e4   :  { %v372_v16 = vpop.f32.mrf.mxu1 }
 0x8e5   :  { %v378_v17 = vadd.f32 %v372_v16, %v314_v15 }
 0x8e6   :  { %v965_v18 = vpop.f32.mrf.mxu1 }
 0x8e7   :  { %1044 = vtanh.f32 %v378_v17  ;;  %v874_v22 = vmul.f32 -1.442695, %v378_v17  ;;  %v1016_v18 = vld [vmem:[%s1320_s1 + $0x8] sm:$0xff]  }
 0x8e8   :  { %v375_v19 = vpop.f32.mrf.mxu1 }
 0x8e9   :  { %1046 = vpow2.f32 %v874_v22  ;;  %v1017_v19 = vld [vmem:[%s1320_s1] sm:$0xff]  }
 0x8ea   :  { %v966_v20 = vpop.f32.mrf.mxu1 }
 0x8f4   :  { %v1045_v21 = vpop.eup %1044 }
 0x8f5   :  { %388 = vrot.lane.b32.xlu1 %v1045_v21, %s1086_s15 }
 0x8f6   :  { %v1047_v23 = vpop.eup %1046 }
 0x8f7   :  { %v382_v24 = vadd.f32 1.0, %v1047_v23 }
 0x8f9   :  { %1048 = vrcp.f32 %v382_v24 }
 0x906   :  { %v1049_v25 = vpop.eup %1048 }
 0x907   :  { %v386_v29 = vmul.f32 %v1049_v25, %v299_v7 }
 0x967   :  { %v389_v26 = vpop.permute.xlu1 %388 }
 0x968   :  { %v391_v27 = vmul.f32 %v1049_v25, %v389_v26 }
 0x96a   :  { %393 = vrot.lane.b32.xlu0 %v391_v27, %s1086_s15 }
 0x9dc   :  { %v394_v30 = vpop.permute.xlu0 %393 }
 0x9dd   :  { %v396_v31 = vadd.f32 %v394_v30, %v386_v29 }
 0x9df   :  { %1050 = vtanh.f32 %v396_v31 }
 0x9ec   :  { %v1051_v34 = vpop.eup %1050 }
 0x9ed   :  { %399 = vrot.lane.b32.xlu1 %v1051_v34, %s1086_s15 }
 0xa5f   :  { %v400_v35 = vpop.permute.xlu1 %399 }
 0xa60   :  { %v1200_v36 = vmul.f32 %v1049_v25, %v400_v35  ;;  %v885_v25 = vld [vmem:[%s1321_s0 + $0x18] sm:$0xff]  }
 0xa61   :  { %v605_v26 = vunpack.c.l.bf16 %v885_v25 }
 0xa62   :  { %v412_v37 = vpack.c.bf16 %v1200_v36, %v1200_v36 }
 0xa64   :  { %418 = vrot.lane.b32.xlu0 %v412_v37, %s1087_s20 }
 0xad6   :  { %v419_v38 = vpop.permute.xlu0 %418 }
 0xad7   :  { %972 = vmatmul.mubr.msk.bf16.vlgmr.msra.gmra.mxu0 %vm16_vm0, %v419_v38 }
 0xad8   :  { %987 = vmatprep.mubr.msk.bf16.mxu0 %vm1085_vm1, %v1084_v0  ;;  %984 = vmatpush3.bf16.msra.mxu0 %v1016_v18 }
 0xad9   :  { %985 = vmatprep.subr.bf16.mxu0 %v1084_v0 }
 0xadc   :  { %986 = vmatpush3.bf16.msra.mxu0 %v1017_v19 }
 0xb97   :  { %v469_v41 = vpop.f32.mrf.mxu0 }
 0xb98   :  { %v475_v42 = vadd.f32 %v469_v41, %v411_v40 }
 0xb99   :  { %v973_v43 = vpop.f32.mrf.mxu0 }
 0xb9a   :  { %1052 = vtanh.f32 %v475_v42  ;;  %v879_v47 = vmul.f32 -1.442695, %v475_v42 }
 0xb9b   :  { %v472_v44 = vpop.f32.mrf.mxu0 }
 0xb9c   :  { %1054 = vpow2.f32 %v879_v47  ;;  %v1018_v44 = vld [vmem:[%s1320_s1 + $0x8] sm:$0xff]  }
 0xb9d   :  { %v974_v45 = vpop.f32.mrf.mxu0 }
 0xb9e   :  { %v1019_v45 = vld [vmem:[%s1320_s1] sm:$0xff]   ;;  %s1088_s1 = smov 96  }
 0xba7   :  { %v1053_v46 = vpop.eup %1052 }
 0xba8   :  { %485 = vrot.lane.b32.xlu1 %v1053_v46, %s1086_s15 }
 0xba9   :  { %v1055_v48 = vpop.eup %1054 }
 0xbaa   :  { %v479_v49 = vadd.f32 1.0, %v1055_v48 }
 0xbac   :  { %1056 = vrcp.f32 %v479_v49 }
 0xbb9   :  { %v1057_v50 = vpop.eup %1056 }
 0xbba   :  { %v483_v54 = vmul.f32 %v1057_v50, %v396_v31 }
 0xc1a   :  { %v486_v52 = vpop.permute.xlu1 %485 }
 0xc1b   :  { %v488_v53 = vmul.f32 %v1057_v50, %v486_v52  ;;  %v702_v52 = vunpack.c.h.bf16 %v885_v25 }
 0xc1d   :  { %490 = vrot.lane.b32.xlu0 %v488_v53, %s1086_s15 }
 0xc8f   :  { %v491_v55 = vpop.permute.xlu0 %490 }
 0xc90   :  { %v493_v56 = vadd.f32 %v491_v55, %v483_v54 }
 0xc92   :  { %1058 = vtanh.f32 %v493_v56 }
 0xc9f   :  { %v1059_v59 = vpop.eup %1058 }
 0xca0   :  { %496 = vrot.lane.b32.xlu1 %v1059_v59, %s1086_s15 }
 0xd12   :  { %v497_v60 = vpop.permute.xlu1 %496 }
 0xd13   :  { %v1222_v61 = vmul.f32 %v1057_v50, %v497_v60 }
 0xd15   :  { %v509_v62 = vpack.c.bf16 %v1222_v61, %v1222_v61 }
 0xd17   :  { %515 = vrot.lane.b32.xlu0 %v509_v62, %s1087_s20 }
 0xd89   :  { %v516_v63 = vpop.permute.xlu0 %515 }
 0xd8a   :  { %980 = vmatmul.mubr.msk.bf16.vlgmr.msra.gmra.mxu1 %vm16_vm0, %v516_v63 }
 0xd8b   :  { %995 = vmatprep.mubr.msk.bf16.mxu1 %vm1085_vm1, %v1084_v0  ;;  %992 = vmatpush3.bf16.msra.mxu1 %v1018_v44 }
 0xd8c   :  { %993 = vmatprep.subr.bf16.mxu1 %v1084_v0 }
 0xd8f   :  { %994 = vmatpush3.bf16.msra.mxu1 %v1019_v45 }
 0xe4a   :  { %v566_v2 = vpop.f32.mrf.mxu1 }
 0xe4b   :  { %v572_v3 = vadd.f32 %v566_v2, %v508_v1 }
 0xe4c   :  { %v981_v4 = vpop.f32.mrf.mxu1 }
 0xe4d   :  { %1060 = vtanh.f32 %v572_v3  ;;  %v884_v8 = vmul.f32 -1.442695, %v572_v3 }
 0xe4e   :  { %v569_v5 = vpop.f32.mrf.mxu1 }
 0xe4f   :  { %1062 = vpow2.f32 %v884_v8 }
 0xe50   :  { %v982_v6 = vpop.f32.mrf.mxu1 }
 0xe5a   :  { %v1061_v7 = vpop.eup %1060 }
 0xe5b   :  { %582 = vrot.lane.b32.xlu1 %v1061_v7, %s1086_s15 }
 0xe5c   :  { %v1063_v9 = vpop.eup %1062 }
 0xe5d   :  { %v576_v10 = vadd.f32 1.0, %v1063_v9 }
 0xe5f   :  { %1064 = vrcp.f32 %v576_v10 }
 0xe6c   :  { %v1065_v11 = vpop.eup %1064 }
 0xe6d   :  { %v580_v15 = vmul.f32 %v1065_v11, %v493_v56 }
 0xecd   :  { %v583_v13 = vpop.permute.xlu1 %582 }
 0xece   :  { %v585_v14 = vmul.f32 %v1065_v11, %v583_v13 }
 0xed0   :  { %587 = vrot.lane.b32.xlu0 %v585_v14, %s1086_s15 }
 0xf42   :  { %v588_v16 = vpop.permute.xlu0 %587 }
 0xf43   :  { %v590_v17 = vadd.f32 %v588_v16, %v580_v15 }
 0xf45   :  { %1066 = vtanh.f32 %v590_v17 }
 0xf52   :  { %v1067_v20 = vpop.eup %1066 }
 0xf53   :  { %593 = vrot.lane.b32.xlu1 %v1067_v20, %s1086_s15 }
 0xfc5   :  { %v594_v21 = vpop.permute.xlu1 %593 }
 0xfc6   :  { %v1240_v22 = vmul.f32 %v1065_v11, %v594_v21 }
 0xfc8   :  { %v606_v23 = vpack.c.bf16 %v1240_v22, %v1240_v22 }
 0xfca   :  { %612 = vrot.lane.b32.xlu0 %v606_v23, %s1087_s20 }
0x103c   :  { %v613_v24 = vpop.permute.xlu0 %612 }
0x103d   :  { %988 = vmatmul.mubr.msk.bf16.vlgmr.msra.gmra.mxu0 %vm16_vm0, %v613_v24 }
0x10fd   :  { %v663_v27 = vpop.f32.mrf.mxu0 }
0x10fe   :  { %v669_v29 = vadd.f32 %v663_v27, %v605_v26 }
0x10ff   :  { %v989_v30 = vpop.f32.mrf.mxu0 }
0x1100   :  { %1068 = vtanh.f32 %v669_v29  ;;  %v889_v34 = vmul.f32 -1.442695, %v669_v29 }
0x1101   :  { %v666_v31 = vpop.f32.mrf.mxu0 }
0x1102   :  { %1070 = vpow2.f32 %v889_v34 }
0x1103   :  { %v990_v32 = vpop.f32.mrf.mxu0 }
0x110d   :  { %v1069_v33 = vpop.eup %1068 }
0x110e   :  { %679 = vrot.lane.b32.xlu1 %v1069_v33, %s1086_s15 }
0x110f   :  { %v1071_v35 = vpop.eup %1070 }
0x1110   :  { %v673_v37 = vadd.f32 1.0, %v1071_v35 }
0x1112   :  { %1072 = vrcp.f32 %v673_v37 }
0x111f   :  { %v1073_v38 = vpop.eup %1072 }
0x1120   :  { %v677_v41 = vmul.f32 %v1073_v38, %v590_v17 }
0x1180   :  { %v680_v39 = vpop.permute.xlu1 %679 }
0x1181   :  { %v682_v40 = vmul.f32 %v1073_v38, %v680_v39 }
0x1183   :  { %684 = vrot.lane.b32.xlu0 %v682_v40, %s1086_s15 }
0x11f5   :  { %v685_v42 = vpop.permute.xlu0 %684 }
0x11f6   :  { %v687_v43 = vadd.f32 %v685_v42, %v677_v41 }
0x11f8   :  { %1074 = vtanh.f32 %v687_v43 }
0x1205   :  { %v1075_v46 = vpop.eup %1074 }
0x1206   :  { %690 = vrot.lane.b32.xlu1 %v1075_v46, %s1086_s15 }
0x1278   :  { %v691_v47 = vpop.permute.xlu1 %690 }
0x1279   :  { %v693_v48 = vmul.f32 %v1073_v38, %v691_v47 }
0x127b   :  { %v703_v49 = vpack.c.bf16 %v693_v48, %v693_v48 }
0x127d   :  { %709 = vrot.lane.b32.xlu0 %v703_v49, %s1087_s20 }
0x12ef   :  { %v710_v50 = vpop.permute.xlu0 %709 }
0x12f0   :  { %996 = vmatmul.mubr.msk.bf16.vlgmr.msra.gmra.mxu1 %vm16_vm0, %v710_v50 }
0x13b0   :  { %v760_v53 = vpop.f32.mrf.mxu1 }
0x13b1   :  { %v766_v54 = vadd.f32 %v760_v53, %v702_v52 }
0x13b2   :  { %v997_v55 = vpop.f32.mrf.mxu1 }
0x13b3   :  { %1076 = vtanh.f32 %v766_v54  ;;  %v894_v58 = vmul.f32 -1.442695, %v766_v54 }
0x13b4   :  { %v763_v56 = vpop.f32.mrf.mxu1 }
0x13b5   :  { %1078 = vpow2.f32 %v894_v58 }
0x13b6   :  { %v998_v57 = vpop.f32.mrf.mxu1 }
0x13c0   :  { %v1077_v0 = vpop.eup %1076 }
0x13c1   :  { %776 = vrot.lane.b32.xlu1 %v1077_v0, %s1086_s15 }
0x13c2   :  { %v1079_v59 = vpop.eup %1078 }
0x13c3   :  { %v770_v60 = vadd.f32 1.0, %v1079_v59 }
0x13c5   :  { %1080 = vrcp.f32 %v770_v60 }
0x13d2   :  { %v1081_v62 = vpop.eup %1080 }
0x13d3   :  { %v774_v2 = vmul.f32 %v1081_v62, %v687_v43 }
0x1433   :  { %v777_v63 = vpop.permute.xlu1 %776 }
0x1434   :  { %v779_v1 = vmul.f32 %v1081_v62, %v777_v63 }
0x1436   :  { %781 = vrot.lane.b32.xlu0 %v779_v1, %s1086_s15 }
0x143a   :  { %114 = vrot.lane.b32.xlu0 %v1140_v28, %s1087_s20 }
0x143e   :  { %307 = vrot.lane.b32.xlu0 %v1181_v12, %s1087_s20 }
0x1442   :  { %501 = vrot.lane.b32.xlu0 %v1222_v61, %s1087_s20 }
0x1446   :  { %695 = vrot.lane.b32.xlu0 %v693_v48, %s1087_s20 }
0x14a8   :  { %v782_v3 = vpop.permute.xlu0 %781 }
0x14a9   :  { %v784_v4 = vadd.f32 %v782_v3, %v774_v2 }
0x14ab   :  { %1082 = vtanh.f32 %v784_v4  ;;  %799 = vrot.lane.b32.xlu0 %v784_v4, %s1088_s1 }
0x14ac   :  { %v115_v5 = vpop.permute.xlu0 %114 }
0x14ad   :  { %117 = vst.msk [vmem:[#allocation4] sm:$0xff] %vm16_vm0, %v115_v5 }
0x14b0   :  { %v308_v6 = vpop.permute.xlu0 %307 }
0x14b1   :  { %311 = vst.msk [vmem:[#allocation4 + $0x10] sm:$0xff] %vm16_vm0, %v308_v6 }
0x14b4   :  { %v803_v28 = vld [vmem:[#allocation4] sm:$0xff]  ;;  %v502_v12 = vpop.permute.xlu0 %501 }
0x14b5   :  { %v903_v7 = vpack.c.bf16 %v803_v28, %v803_v28  ;;  %505 = vst.msk [vmem:[#allocation4 + $0x20] sm:$0xff] %vm16_vm0, %v502_v12 }
0x14b7   :  { %844 = vst.msk [vmem:[%s1322_s2] sm:$0xf] %vm843_vm2, %v903_v7 }
0x14b8   :  { %v1083_v61 = vpop.eup %1082  ;;  %v805_v8 = vld [vmem:[#allocation4 + $0x10] sm:$0xff]  ;;  %v696_v9 = vpop.permute.xlu0 %695 }
0x14b9   :  { %v905_v10 = vpack.c.bf16 %v805_v8, %v805_v8  ;;  %699 = vst.msk [vmem:[#allocation4 + $0x30] sm:$0xff] %vm16_vm0, %v696_v9  ;;  %787 = vrot.lane.b32.xlu1 %v1083_v61, %s1086_s15 }
0x14bb   :  { %846 = vst.msk [vmem:[%s1322_s2 + $0x8] sm:$0xf] %vm843_vm2, %v905_v10 }
0x14bc   :  { %v807_v11 = vld [vmem:[#allocation4 + $0x20] sm:$0xff] }
0x14bd   :  { %v907_v13 = vpack.c.bf16 %v807_v11, %v807_v11  ;;  %210 = vrot.lane.b32.xlu1 %v1159_v51, %s1087_s20 }
0x14bf   :  { %848 = vst.msk [vmem:[%s1322_s2 + $0x10] sm:$0xf] %vm843_vm2, %v907_v13 }
0x14c0   :  { %v809_v14 = vld [vmem:[#allocation4 + $0x30] sm:$0xff] }
0x14c1   :  { %v909_v15 = vpack.c.bf16 %v809_v14, %v809_v14  ;;  %404 = vrot.lane.b32.xlu1 %v1200_v36, %s1087_s20 }
0x14c3   :  { %850 = vst.msk [vmem:[%s1322_s2 + $0x18] sm:$0xf] %vm843_vm2, %v909_v15 }
0x14c5   :  { %598 = vrot.lane.b32.xlu1 %v1240_v22, %s1087_s20 }
0x151d   :  { %v800_v16 = vpop.permute.xlu0 %799 }
0x151e   :  { %802 = vst.msk [vmem:[#allocation3] sm:$0xff] %vm16_vm0, %v800_v16 }
0x152b   :  { %v788_v51 = vpop.permute.xlu1 %787 }
0x152c   :  { %v790_v17 = vmul.f32 %v1081_v62, %v788_v51 }
0x152e   :  { %792 = vrot.lane.b32.xlu1 %v790_v17, %s1087_s20 }
0x152f   :  { %v211_v18 = vpop.permute.xlu1 %210 }
0x1530   :  { %214 = vst.msk [vmem:[#allocation4 + $0x8] sm:$0xff] %vm16_vm0, %v211_v18 }
0x1533   :  { %v405_v19 = vpop.permute.xlu1 %404 }
0x1534   :  { %408 = vst.msk [vmem:[#allocation4 + $0x18] sm:$0xff] %vm16_vm0, %v405_v19 }
0x1537   :  { %v804_v36 = vld [vmem:[#allocation4 + $0x8] sm:$0xff]  ;;  %v599_v20 = vpop.permute.xlu1 %598 }
0x1538   :  { %v904_v21 = vpack.c.bf16 %v804_v36, %v804_v36  ;;  %602 = vst.msk [vmem:[#allocation4 + $0x28] sm:$0xff] %vm16_vm0, %v599_v20 }
0x153a   :  { %845 = vst.msk [vmem:[%s1322_s2 + $0x4] sm:$0xf] %vm843_vm2, %v904_v21 }
0x153b   :  { %v806_v22 = vld [vmem:[#allocation4 + $0x18] sm:$0xff] }
0x153c   :  { %v906_v23 = vpack.c.bf16 %v806_v22, %v806_v22 }
0x153e   :  { %847 = vst.msk [vmem:[%s1322_s2 + $0xc] sm:$0xf] %vm843_vm2, %v906_v23 }
0x153f   :  { %v808_v24 = vld [vmem:[#allocation4 + $0x28] sm:$0xff] }
0x1540   :  { %v908_v25 = vpack.c.bf16 %v808_v24, %v808_v24 }
0x1542   :  { %849 = vst.msk [vmem:[%s1322_s2 + $0x14] sm:$0xf] %vm843_vm2, %v908_v25 }
0x15a0   :  { %v793_v26 = vpop.permute.xlu1 %792 }
0x15a1   :  { %796 = vst.msk [vmem:[#allocation4 + $0x38] sm:$0xff] %vm16_vm0, %v793_v26  ;;  %797 = vst.msk [vmem:[#allocation2] sm:$0xff] %vm16_vm0, %v793_v26 }
0x15a8   :  { %v810_v27 = vld [vmem:[#allocation4 + $0x38] sm:$0xff] }
0x15a9   :  { %v910_v29 = vpack.c.bf16 %v810_v27, %v810_v27 }
0x15ab   :  { %851 = vst.msk [vmem:[%s1322_s2 + $0x1c] sm:$0xf] %vm843_vm2, %v910_v29 }

// kernel: lstm_seq2seq_forward.7
= control target key start
LH: loop header
LB: loop body
LE: loop exit
PB: predicated region body
PF: predicated region fallthrough
CT: control target
= control target key end

     0   :  { %vm22_vm0 = vcmask 261120   ;;  %v1172_v0 = vmov 0.0   ;;  %vm1173_vm1 = vmmov 0   ;;  %s1174_s21 = smov 32   ;;  %s1175_s26 = smov 64   ;;  %s1423_s1 = inlined_call_operand.vmem [shape: bf16[32,128], index: 1, kind: input, shape index: {}]   ;;  %s1424_s0 = inlined_call_operand.vmem [shape: bf16[8,8,128], index: 0, kind: input, shape index: {}]   ;;  %s1425_s2 = inlined_call_operand.vmem [shape: bf16[32,128], index: 2, kind: input, shape index: {}]   ;;  %s1426_s3 = inlined_call_operand.vmem [shape: f32[1,128], index: 3, kind: input, shape index: {}]   ;;  %s1427_s4 = inlined_call_operand.vmem [shape: f32[64,128], index: 4, kind: output, shape index: {}]  }
   0x1   :  { %1009 = vmatprep.subr.bf16.mxu1 %v1172_v0  ;;  %v1090_v1 = vld [vmem:[%s1423_s1 + $0x8] sm:$0xff]   ;;  %1013 = vmatprep.mubr.msk.bf16.mxu1 %vm1173_vm1, %v1172_v0  ;;  %23 = vst.msk [vmem:[#allocation2] sm:$0xff] %vm22_vm0, %v1172_v0  ;;  %24 = vst.msk [vmem:[#allocation3] sm:$0xff] %vm22_vm0, %v1172_v0  ;;  %v1091_v2 = vld [vmem:[%s1423_s1] sm:$0xff]  }
   0x2   :  { %1025 = vmatprep.subr.bf16.mxu0 %v1172_v0  ;;  %1029 = vmatprep.mubr.msk.bf16.mxu0 %vm1173_vm1, %v1172_v0  ;;  %v27_v5 = vld [vmem:[%s1424_s0] sm:$0xff]   ;;  %v1092_v24 = vld [vmem:[%s1423_s1 + $0x8] sm:$0xff]  }
   0x3   :  { %1010 = vmatpush3.bf16.msra.mxu1 %v1090_v1  ;;  %v28_v6 = vunpack.c.l.bf16 %v27_v5  ;;  %v1093_v25 = vld [vmem:[%s1423_s1] sm:$0xff]   ;;  %v126_v31 = vunpack.c.h.bf16 %v27_v5  ;;  %v1094_v47 = vld [vmem:[%s1423_s1 + $0x8] sm:$0xff]  }
   0x4   :  { %1011 = vmatprep.subr.bf16.mxu1 %v1172_v0  ;;  %1026 = vmatpush3.bf16.msra.mxu0 %v1094_v47  ;;  %v1095_v48 = vld [vmem:[%s1423_s1] sm:$0xff]   ;;  %v942_v54 = vld [vmem:[%s1424_s0 + $0x8] sm:$0xff]  }
   0x5   :  { %1027 = vmatprep.subr.bf16.mxu0 %v1172_v0  ;;  %v223_v55 = vunpack.c.l.bf16 %v942_v54 }
   0x7   :  { %1012 = vmatpush3.bf16.msra.mxu1 %v1091_v2 }
   0x8   :  { %v25_v3 = vld [vmem:[#allocation2] sm:$0xff]  ;;  %1017 = vmatprep.subr.bf16.mxu1 %v1172_v0  ;;  %v26_v13 = vld [vmem:[#allocation3] sm:$0xff]  ;;  %1028 = vmatpush3.bf16.msra.mxu0 %v1095_v48 }
   0x9   :  { %v29_v4 = vpack.c.bf16 %v25_v3, %v25_v3  ;;  %1041 = vmatprep.subr.bf16.mxu0 %v1172_v0 }
   0xb   :  { %1014 = vmatmul.mubr.msk.bf16.vlgmr.msra.gmra.mxu1 %vm22_vm0, %v29_v4 }
   0xc   :  { %1021 = vmatprep.mubr.msk.bf16.mxu1 %vm1173_vm1, %v1172_v0  ;;  %1018 = vmatpush3.bf16.msra.mxu1 %v1092_v24 }
   0xd   :  { %1019 = vmatprep.subr.bf16.mxu1 %v1172_v0 }
  0x10   :  { %1020 = vmatpush3.bf16.msra.mxu1 %v1093_v25 }
  0x11   :  { %1033 = vmatprep.subr.bf16.mxu1 %v1172_v0 }
  0xcb   :  { %v84_v7 = vpop.f32.mrf.mxu1 }
  0xcc   :  { %v90_v8 = vadd.f32 %v84_v7, %v28_v6 }
  0xcd   :  { %v1015_v9 = vpop.f32.mrf.mxu1 }
  0xce   :  { %1108 = vtanh.f32 %v90_v8  ;;  %v936_v14 = vmul.f32 -1.442695, %v90_v8  ;;  %v1096_v8 = vld [vmem:[%s1423_s1 + $0x8] sm:$0xff]   ;;  %v1097_v9 = vld [vmem:[%s1423_s1] sm:$0xff]  }
  0xcf   :  { %v87_v10 = vpop.f32.mrf.mxu1 }
  0xd0   :  { %1110 = vpow2.f32 %v936_v14 }
  0xd1   :  { %v1016_v11 = vpop.f32.mrf.mxu1 }
  0xdb   :  { %v1109_v12 = vpop.eup %1108 }
  0xdc   :  { %104 = vrot.lane.b32.xlu0 %v1109_v12, %s1174_s21 }
  0xdd   :  { %v1111_v15 = vpop.eup %1110 }
  0xde   :  { %v94_v16 = vadd.f32 1.0, %v1111_v15  ;;  %v320_v15 = vunpack.c.h.bf16 %v942_v54 }
  0xe0   :  { %99 = vrot.lane.b32.xlu0 %v26_v13, %s1174_s21  ;;  %1112 = vrcp.f32 %v94_v16 }
  0xed   :  { %v1113_v17 = vpop.eup %1112 }
 0x14e   :  { %v105_v18 = vpop.permute.xlu0 %104 }
 0x14f   :  { %v107_v19 = vmul.f32 %v1113_v17, %v105_v18 }
 0x151   :  { %109 = vrot.lane.b32.xlu1 %v107_v19, %s1174_s21 }
 0x152   :  { %v100_v20 = vpop.permute.xlu0 %99 }
 0x153   :  { %v102_v21 = vmul.f32 %v1113_v17, %v100_v20 }
 0x1c3   :  { %v110_v22 = vpop.permute.xlu1 %109 }
 0x1c4   :  { %v112_v23 = vadd.f32 %v110_v22, %v102_v21 }
 0x1c6   :  { %1114 = vtanh.f32 %v112_v23 }
 0x1d3   :  { %v1115_v26 = vpop.eup %1114 }
 0x1d4   :  { %115 = vrot.lane.b32.xlu1 %v1115_v26, %s1174_s21 }
 0x246   :  { %v116_v27 = vpop.permute.xlu1 %115 }
 0x247   :  { %v1238_v28 = vmul.f32 %v1113_v17, %v116_v27 }
 0x249   :  { %v127_v29 = vpack.c.bf16 %v1238_v28, %v1238_v28 }
 0x24b   :  { %133 = vrot.lane.b32.xlu0 %v127_v29, %s1175_s26 }
 0x2bd   :  { %v134_v30 = vpop.permute.xlu0 %133 }
 0x2be   :  { %1022 = vmatmul.mubr.msk.bf16.vlgmr.msra.gmra.mxu1 %vm22_vm0, %v134_v30 }
 0x2bf   :  { %1037 = vmatprep.mubr.msk.bf16.mxu1 %vm1173_vm1, %v1172_v0  ;;  %1034 = vmatpush3.bf16.msra.mxu1 %v1096_v8 }
 0x2c0   :  { %1035 = vmatprep.subr.bf16.mxu1 %v1172_v0 }
 0x2c3   :  { %1036 = vmatpush3.bf16.msra.mxu1 %v1097_v9 }
 0x2c4   :  { %1049 = vmatprep.subr.bf16.mxu1 %v1172_v0 }
 0x37e   :  { %v184_v32 = vpop.f32.mrf.mxu1 }
 0x37f   :  { %v190_v33 = vadd.f32 %v184_v32, %v126_v31  ;;  %v1098_v32 = vld [vmem:[%s1423_s1 + $0x8] sm:$0xff]  }
 0x380   :  { %v1023_v34 = vpop.f32.mrf.mxu1 }
 0x381   :  { %1116 = vtanh.f32 %v190_v33  ;;  %v941_v38 = vmul.f32 -1.442695, %v190_v33  ;;  %v1099_v33 = vld [vmem:[%s1423_s1] sm:$0xff]  }
 0x382   :  { %v187_v35 = vpop.f32.mrf.mxu1 }
 0x383   :  { %1118 = vpow2.f32 %v941_v38 }
 0x384   :  { %v1024_v36 = vpop.f32.mrf.mxu1 }
 0x38e   :  { %v1117_v37 = vpop.eup %1116 }
 0x38f   :  { %200 = vrot.lane.b32.xlu1 %v1117_v37, %s1174_s21 }
 0x390   :  { %v1119_v39 = vpop.eup %1118 }
 0x391   :  { %v194_v40 = vadd.f32 1.0, %v1119_v39  ;;  %v952_v39 = vld [vmem:[%s1424_s0 + $0x10] sm:$0xff]  }
 0x393   :  { %1120 = vrcp.f32 %v194_v40  ;;  %v417_v40 = vunpack.c.l.bf16 %v952_v39 }
 0x3a0   :  { %v1121_v41 = vpop.eup %1120 }
 0x3a1   :  { %v198_v44 = vmul.f32 %v1121_v41, %v112_v23 }
 0x401   :  { %v201_v42 = vpop.permute.xlu1 %200 }
 0x402   :  { %v203_v43 = vmul.f32 %v1121_v41, %v201_v42 }
 0x404   :  { %205 = vrot.lane.b32.xlu0 %v203_v43, %s1174_s21 }
 0x476   :  { %v206_v45 = vpop.permute.xlu0 %205 }
 0x477   :  { %v208_v46 = vadd.f32 %v206_v45, %v198_v44 }
 0x479   :  { %1122 = vtanh.f32 %v208_v46 }
 0x486   :  { %v1123_v49 = vpop.eup %1122 }
 0x487   :  { %211 = vrot.lane.b32.xlu1 %v1123_v49, %s1174_s21 }
 0x4f9   :  { %v212_v50 = vpop.permute.xlu1 %211 }
 0x4fa   :  { %v1257_v51 = vmul.f32 %v1121_v41, %v212_v50 }
 0x4fc   :  { %v224_v52 = vpack.c.bf16 %v1257_v51, %v1257_v51 }
 0x4fe   :  { %230 = vrot.lane.b32.xlu0 %v224_v52, %s1175_s26 }
 0x570   :  { %v231_v53 = vpop.permute.xlu0 %230 }
 0x571   :  { %1030 = vmatmul.mubr.msk.bf16.vlgmr.msra.gmra.mxu0 %vm22_vm0, %v231_v53 }
 0x572   :  { %1045 = vmatprep.mubr.msk.bf16.mxu0 %vm1173_vm1, %v1172_v0  ;;  %1042 = vmatpush3.bf16.msra.mxu0 %v1098_v32 }
 0x573   :  { %1043 = vmatprep.subr.bf16.mxu0 %v1172_v0 }
 0x576   :  { %1044 = vmatpush3.bf16.msra.mxu0 %v1099_v33 }
 0x577   :  { %1057 = vmatprep.subr.bf16.mxu0 %v1172_v0 }
 0x631   :  { %v281_v56 = vpop.f32.mrf.mxu0 }
 0x632   :  { %v287_v57 = vadd.f32 %v281_v56, %v223_v55 }
 0x633   :  { %v1031_v58 = vpop.f32.mrf.mxu0 }
 0x634   :  { %1124 = vtanh.f32 %v287_v57  ;;  %v946_v62 = vmul.f32 -1.442695, %v287_v57  ;;  %v1100_v57 = vld [vmem:[%s1423_s1 + $0x8] sm:$0xff]   ;;  %v1101_v58 = vld [vmem:[%s1423_s1] sm:$0xff]  }
 0x635   :  { %v284_v59 = vpop.f32.mrf.mxu0 }
 0x636   :  { %1126 = vpow2.f32 %v946_v62 }
 0x637   :  { %v1032_v60 = vpop.f32.mrf.mxu0 }
 0x641   :  { %v1125_v61 = vpop.eup %1124 }
 0x642   :  { %297 = vrot.lane.b32.xlu1 %v1125_v61, %s1174_s21 }
 0x643   :  { %v1127_v63 = vpop.eup %1126 }
 0x644   :  { %v291_v1 = vadd.f32 1.0, %v1127_v63 }
 0x646   :  { %1128 = vrcp.f32 %v291_v1  ;;  %v514_v1 = vunpack.c.h.bf16 %v952_v39 }
 0x653   :  { %v1129_v2 = vpop.eup %1128 }
 0x654   :  { %v295_v5 = vmul.f32 %v1129_v2, %v208_v46 }
 0x6b4   :  { %v298_v3 = vpop.permute.xlu1 %297 }
 0x6b5   :  { %v300_v4 = vmul.f32 %v1129_v2, %v298_v3 }
 0x6b7   :  { %302 = vrot.lane.b32.xlu0 %v300_v4, %s1174_s21 }
 0x729   :  { %v303_v6 = vpop.permute.xlu0 %302 }
 0x72a   :  { %v305_v7 = vadd.f32 %v303_v6, %v295_v5 }
 0x72c   :  { %1130 = vtanh.f32 %v305_v7 }
 0x739   :  { %v1131_v10 = vpop.eup %1130 }
 0x73a   :  { %308 = vrot.lane.b32.xlu1 %v1131_v10, %s1174_s21 }
 0x7ac   :  { %v309_v11 = vpop.permute.xlu1 %308 }
 0x7ad   :  { %v1279_v12 = vmul.f32 %v1129_v2, %v309_v11 }
 0x7af   :  { %v321_v13 = vpack.c.bf16 %v1279_v12, %v1279_v12 }
 0x7b1   :  { %327 = vrot.lane.b32.xlu0 %v321_v13, %s1175_s26 }
 0x823   :  { %v328_v14 = vpop.permute.xlu0 %327 }
 0x824   :  { %1038 = vmatmul.mubr.msk.bf16.vlgmr.msra.gmra.mxu1 %vm22_vm0, %v328_v14 }
 0x825   :  { %1053 = vmatprep.mubr.msk.bf16.mxu1 %vm1173_vm1, %v1172_v0  ;;  %1050 = vmatpush3.bf16.msra.mxu1 %v1100_v57 }
 0x826   :  { %1051 = vmatprep.subr.bf16.mxu1 %v1172_v0 }
 0x829   :  { %1052 = vmatpush3.bf16.msra.mxu1 %v1101_v58 }
 0x82a   :  { %1065 = vmatprep.subr.bf16.mxu1 %v1172_v0 }
 0x8e4   :  { %v378_v16 = vpop.f32.mrf.mxu1 }
 0x8e5   :  { %v384_v17 = vadd.f32 %v378_v16, %v320_v15 }
 0x8e6   :  { %v1039_v18 = vpop.f32.mrf.mxu1 }
 0x8e7   :  { %1132 = vtanh.f32 %v384_v17  ;;  %v951_v22 = vmul.f32 -1.442695, %v384_v17  ;;  %v1102_v18 = vld [vmem:[%s1423_s1 + $0x8] sm:$0xff]  }
 0x8e8   :  { %v381_v19 = vpop.f32.mrf.mxu1 }
 0x8e9   :  { %1134 = vpow2.f32 %v951_v22  ;;  %v1103_v19 = vld [vmem:[%s1423_s1] sm:$0xff]  }
 0x8ea   :  { %v1040_v20 = vpop.f32.mrf.mxu1 }
 0x8f4   :  { %v1133_v21 = vpop.eup %1132 }
 0x8f5   :  { %394 = vrot.lane.b32.xlu1 %v1133_v21, %s1174_s21 }
 0x8f6   :  { %v1135_v23 = vpop.eup %1134 }
 0x8f7   :  { %v388_v24 = vadd.f32 1.0, %v1135_v23 }
 0x8f9   :  { %1136 = vrcp.f32 %v388_v24 }
 0x906   :  { %v1137_v25 = vpop.eup %1136 }
 0x907   :  { %v392_v29 = vmul.f32 %v1137_v25, %v305_v7 }
 0x967   :  { %v395_v26 = vpop.permute.xlu1 %394 }
 0x968   :  { %v397_v27 = vmul.f32 %v1137_v25, %v395_v26 }
 0x96a   :  { %399 = vrot.lane.b32.xlu0 %v397_v27, %s1174_s21 }
 0x9dc   :  { %v400_v30 = vpop.permute.xlu0 %399 }
 0x9dd   :  { %v402_v31 = vadd.f32 %v400_v30, %v392_v29 }
 0x9df   :  { %1138 = vtanh.f32 %v402_v31 }
 0x9ec   :  { %v1139_v34 = vpop.eup %1138 }
 0x9ed   :  { %405 = vrot.lane.b32.xlu1 %v1139_v34, %s1174_s21 }
 0xa5f   :  { %v406_v35 = vpop.permute.xlu1 %405 }
 0xa60   :  { %v1298_v36 = vmul.f32 %v1137_v25, %v406_v35  ;;  %v962_v25 = vld [vmem:[%s1424_s0 + $0x18] sm:$0xff]  }
 0xa61   :  { %v611_v26 = vunpack.c.l.bf16 %v962_v25 }
 0xa62   :  { %v418_v37 = vpack.c.bf16 %v1298_v36, %v1298_v36 }
 0xa64   :  { %424 = vrot.lane.b32.xlu0 %v418_v37, %s1175_s26 }
 0xad6   :  { %v425_v38 = vpop.permute.xlu0 %424 }
 0xad7   :  { %1046 = vmatmul.mubr.msk.bf16.vlgmr.msra.gmra.mxu0 %vm22_vm0, %v425_v38 }
 0xad8   :  { %1061 = vmatprep.mubr.msk.bf16.mxu0 %vm1173_vm1, %v1172_v0  ;;  %1058 = vmatpush3.bf16.msra.mxu0 %v1102_v18 }
 0xad9   :  { %1059 = vmatprep.subr.bf16.mxu0 %v1172_v0 }
 0xadc   :  { %1060 = vmatpush3.bf16.msra.mxu0 %v1103_v19 }
 0xb97   :  { %v475_v41 = vpop.f32.mrf.mxu0 }
 0xb98   :  { %v481_v42 = vadd.f32 %v475_v41, %v417_v40 }
 0xb99   :  { %v1047_v43 = vpop.f32.mrf.mxu0 }
 0xb9a   :  { %1140 = vtanh.f32 %v481_v42  ;;  %v956_v47 = vmul.f32 -1.442695, %v481_v42 }
 0xb9b   :  { %v478_v44 = vpop.f32.mrf.mxu0 }
 0xb9c   :  { %1142 = vpow2.f32 %v956_v47  ;;  %v1104_v44 = vld [vmem:[%s1423_s1 + $0x8] sm:$0xff]  }
 0xb9d   :  { %v1048_v45 = vpop.f32.mrf.mxu0 }
 0xb9e   :  { %v1105_v45 = vld [vmem:[%s1423_s1] sm:$0xff]   ;;  %s1176_s1 = smov 96  }
 0xba7   :  { %v1141_v46 = vpop.eup %1140 }
 0xba8   :  { %491 = vrot.lane.b32.xlu1 %v1141_v46, %s1174_s21 }
 0xba9   :  { %v1143_v48 = vpop.eup %1142 }
 0xbaa   :  { %v485_v49 = vadd.f32 1.0, %v1143_v48 }
 0xbac   :  { %1144 = vrcp.f32 %v485_v49 }
 0xbb9   :  { %v1145_v50 = vpop.eup %1144 }
 0xbba   :  { %v489_v54 = vmul.f32 %v1145_v50, %v402_v31 }
 0xc1a   :  { %v492_v52 = vpop.permute.xlu1 %491 }
 0xc1b   :  { %v494_v53 = vmul.f32 %v1145_v50, %v492_v52  ;;  %v708_v52 = vunpack.c.h.bf16 %v962_v25 }
 0xc1d   :  { %496 = vrot.lane.b32.xlu0 %v494_v53, %s1174_s21 }
 0xc8f   :  { %v497_v55 = vpop.permute.xlu0 %496 }
 0xc90   :  { %v499_v56 = vadd.f32 %v497_v55, %v489_v54 }
 0xc92   :  { %1146 = vtanh.f32 %v499_v56 }
 0xc9f   :  { %v1147_v59 = vpop.eup %1146 }
 0xca0   :  { %502 = vrot.lane.b32.xlu1 %v1147_v59, %s1174_s21 }
 0xd12   :  { %v503_v60 = vpop.permute.xlu1 %502 }
 0xd13   :  { %v1320_v61 = vmul.f32 %v1145_v50, %v503_v60 }
 0xd15   :  { %v515_v62 = vpack.c.bf16 %v1320_v61, %v1320_v61 }
 0xd17   :  { %521 = vrot.lane.b32.xlu0 %v515_v62, %s1175_s26 }
 0xd89   :  { %v522_v63 = vpop.permute.xlu0 %521 }
 0xd8a   :  { %1054 = vmatmul.mubr.msk.bf16.vlgmr.msra.gmra.mxu1 %vm22_vm0, %v522_v63 }
 0xd8b   :  { %1069 = vmatprep.mubr.msk.bf16.mxu1 %vm1173_vm1, %v1172_v0  ;;  %1066 = vmatpush3.bf16.msra.mxu1 %v1104_v44 }
 0xd8c   :  { %1067 = vmatprep.subr.bf16.mxu1 %v1172_v0 }
 0xd8f   :  { %1068 = vmatpush3.bf16.msra.mxu1 %v1105_v45 }
 0xe4a   :  { %v572_v2 = vpop.f32.mrf.mxu1 }
 0xe4b   :  { %v578_v3 = vadd.f32 %v572_v2, %v514_v1 }
 0xe4c   :  { %v1055_v4 = vpop.f32.mrf.mxu1 }
 0xe4d   :  { %1148 = vtanh.f32 %v578_v3  ;;  %v961_v8 = vmul.f32 -1.442695, %v578_v3 }
 0xe4e   :  { %v575_v5 = vpop.f32.mrf.mxu1 }
 0xe4f   :  { %1150 = vpow2.f32 %v961_v8  ;;  %v1107_v8 = vld [vmem:[%s1425_s2] sm:$0xff]  }
 0xe50   :  { %v1056_v6 = vpop.f32.mrf.mxu1 }
 0xe5a   :  { %v1149_v7 = vpop.eup %1148 }
 0xe5b   :  { %588 = vrot.lane.b32.xlu1 %v1149_v7, %s1174_s21 }
 0xe5c   :  { %v1151_v9 = vpop.eup %1150 }
 0xe5d   :  { %v582_v10 = vadd.f32 1.0, %v1151_v9 }
 0xe5f   :  { %1152 = vrcp.f32 %v582_v10 }
 0xe6c   :  { %v1153_v11 = vpop.eup %1152 }
 0xe6d   :  { %v586_v15 = vmul.f32 %v1153_v11, %v499_v56 }
 0xecd   :  { %v589_v13 = vpop.permute.xlu1 %588 }
 0xece   :  { %v591_v14 = vmul.f32 %v1153_v11, %v589_v13 }
 0xed0   :  { %593 = vrot.lane.b32.xlu0 %v591_v14, %s1174_s21 }
 0xf42   :  { %v594_v16 = vpop.permute.xlu0 %593 }
 0xf43   :  { %v596_v17 = vadd.f32 %v594_v16, %v586_v15 }
 0xf45   :  { %1154 = vtanh.f32 %v596_v17 }
 0xf52   :  { %v1155_v20 = vpop.eup %1154 }
 0xf53   :  { %599 = vrot.lane.b32.xlu1 %v1155_v20, %s1174_s21 }
 0xfc5   :  { %v600_v21 = vpop.permute.xlu1 %599 }
 0xfc6   :  { %v1338_v22 = vmul.f32 %v1153_v11, %v600_v21 }
 0xfc8   :  { %v612_v23 = vpack.c.bf16 %v1338_v22, %v1338_v22 }
 0xfca   :  { %618 = vrot.lane.b32.xlu0 %v612_v23, %s1175_s26 }
0x103c   :  { %v619_v24 = vpop.permute.xlu0 %618 }
0x103d   :  { %1062 = vmatmul.mubr.msk.bf16.vlgmr.msra.gmra.mxu0 %vm22_vm0, %v619_v24 }
0x10fd   :  { %v669_v27 = vpop.f32.mrf.mxu0 }
0x10fe   :  { %v675_v29 = vadd.f32 %v669_v27, %v611_v26  ;;  %v972_v27 = vld [vmem:[%s1426_s3] ss:$0 sm:$0xff] }
0x10ff   :  { %v1063_v30 = vpop.f32.mrf.mxu0 }
0x1100   :  { %1156 = vtanh.f32 %v675_v29  ;;  %v966_v34 = vmul.f32 -1.442695, %v675_v29 }
0x1101   :  { %v672_v31 = vpop.f32.mrf.mxu0 }
0x1102   :  { %1158 = vpow2.f32 %v966_v34 }
0x1103   :  { %v1064_v32 = vpop.f32.mrf.mxu0 }
0x110d   :  { %v1157_v33 = vpop.eup %1156 }
0x110e   :  { %685 = vrot.lane.b32.xlu1 %v1157_v33, %s1174_s21 }
0x110f   :  { %v1159_v35 = vpop.eup %1158 }
0x1110   :  { %v679_v37 = vadd.f32 1.0, %v1159_v35 }
0x1112   :  { %1160 = vrcp.f32 %v679_v37 }
0x111f   :  { %v1161_v38 = vpop.eup %1160 }
0x1120   :  { %v683_v41 = vmul.f32 %v1161_v38, %v596_v17 }
0x1180   :  { %v686_v39 = vpop.permute.xlu1 %685 }
0x1181   :  { %v688_v40 = vmul.f32 %v1161_v38, %v686_v39 }
0x1183   :  { %690 = vrot.lane.b32.xlu0 %v688_v40, %s1174_s21 }
0x11f5   :  { %v691_v42 = vpop.permute.xlu0 %690 }
0x11f6   :  { %v693_v43 = vadd.f32 %v691_v42, %v683_v41 }
0x11f8   :  { %1162 = vtanh.f32 %v693_v43 }
0x1205   :  { %v1163_v46 = vpop.eup %1162 }
0x1206   :  { %696 = vrot.lane.b32.xlu1 %v1163_v46, %s1174_s21 }
0x1278   :  { %v697_v47 = vpop.permute.xlu1 %696 }
0x1279   :  { %v699_v48 = vmul.f32 %v1161_v38, %v697_v47 }
0x127b   :  { %v709_v49 = vpack.c.bf16 %v699_v48, %v699_v48 }
0x127d   :  { %715 = vrot.lane.b32.xlu0 %v709_v49, %s1175_s26 }
0x12ef   :  { %v716_v50 = vpop.permute.xlu0 %715 }
0x12f0   :  { %1070 = vmatmul.mubr.msk.bf16.vlgmr.msra.gmra.mxu1 %vm22_vm0, %v716_v50 }
0x13b0   :  { %v766_v53 = vpop.f32.mrf.mxu1 }
0x13b1   :  { %v772_v54 = vadd.f32 %v766_v53, %v708_v52 }
0x13b2   :  { %v1071_v55 = vpop.f32.mrf.mxu1 }
0x13b3   :  { %1164 = vtanh.f32 %v772_v54  ;;  %v971_v58 = vmul.f32 -1.442695, %v772_v54 }
0x13b4   :  { %v769_v56 = vpop.f32.mrf.mxu1 }
0x13b5   :  { %1166 = vpow2.f32 %v971_v58 }
0x13b6   :  { %v1072_v57 = vpop.f32.mrf.mxu1 }
0x13c0   :  { %v1165_v0 = vpop.eup %1164 }
0x13c1   :  { %782 = vrot.lane.b32.xlu1 %v1165_v0, %s1174_s21 }
0x13c2   :  { %v1167_v59 = vpop.eup %1166 }
0x13c3   :  { %v776_v60 = vadd.f32 1.0, %v1167_v59 }
0x13c5   :  { %1168 = vrcp.f32 %v776_v60 }
0x13d2   :  { %v1169_v62 = vpop.eup %1168 }
0x13d3   :  { %v780_v2 = vmul.f32 %v1169_v62, %v693_v43 }
0x1433   :  { %v783_v63 = vpop.permute.xlu1 %782 }
0x1434   :  { %v785_v1 = vmul.f32 %v1169_v62, %v783_v63 }
0x1436   :  { %787 = vrot.lane.b32.xlu0 %v785_v1, %s1174_s21 }
0x143a   :  { %120 = vrot.lane.b32.xlu0 %v1238_v28, %s1175_s26 }
0x143e   :  { %313 = vrot.lane.b32.xlu0 %v1279_v12, %s1175_s26  ;;  %v1106_v12 = vld [vmem:[%s1425_s2 + $0x8] sm:$0xff]  }
0x143f   :  { %1073 = vmatprep.subr.bf16.mxu0 %v1106_v12 }
0x1440   :  { %1074 = vmatpush3.bf16.msra.mxu0 %v1106_v12 }
0x1441   :  { %1075 = vmatprep.subr.bf16.mxu0 %v1107_v8 }
0x1442   :  { %507 = vrot.lane.b32.xlu0 %v1320_v61, %s1175_s26 }
0x1444   :  { %1076 = vmatpush3.bf16.msra.mxu0 %v1107_v8 }
0x1446   :  { %701 = vrot.lane.b32.xlu0 %v699_v48, %s1175_s26 }
0x14a8   :  { %v788_v3 = vpop.permute.xlu0 %787 }
0x14a9   :  { %v790_v4 = vadd.f32 %v788_v3, %v780_v2 }
0x14ab   :  { %1170 = vtanh.f32 %v790_v4  ;;  %805 = vrot.lane.b32.xlu0 %v790_v4, %s1176_s1 }
0x14ac   :  { %v121_v5 = vpop.permute.xlu0 %120 }
0x14ad   :  { %123 = vst.msk [vmem:[#allocation4] sm:$0xff] %vm22_vm0, %v121_v5 }
0x14b0   :  { %v314_v6 = vpop.permute.xlu0 %313 }
0x14b1   :  { %317 = vst.msk [vmem:[#allocation4 + $0x10] sm:$0xff] %vm22_vm0, %v314_v6 }
0x14b4   :  { %v508_v28 = vpop.permute.xlu0 %507  ;;  %v809_v15 = vld [vmem:[#allocation4] sm:$0xff] }
0x14b5   :  { %511 = vst.msk [vmem:[#allocation4 + $0x20] sm:$0xff] %vm22_vm0, %v508_v28 }
0x14b8   :  { %v1171_v61 = vpop.eup %1170  ;;  %v702_v7 = vpop.permute.xlu0 %701  ;;  %v811_v17 = vld [vmem:[#allocation4 + $0x10] sm:$0xff] }
0x14b9   :  { %705 = vst.msk [vmem:[#allocation4 + $0x30] sm:$0xff] %vm22_vm0, %v702_v7  ;;  %793 = vrot.lane.b32.xlu1 %v1171_v61, %s1174_s21 }
0x14bc   :  { %v813_v20 = vld [vmem:[#allocation4 + $0x20] sm:$0xff] }
0x14bd   :  { %216 = vrot.lane.b32.xlu1 %v1257_v51, %s1175_s26 }
0x14c0   :  { %v815_v24 = vld [vmem:[#allocation4 + $0x30] sm:$0xff] }
0x14c1   :  { %410 = vrot.lane.b32.xlu1 %v1298_v36, %s1175_s26 }
0x14c5   :  { %604 = vrot.lane.b32.xlu1 %v1338_v22, %s1175_s26 }
0x151d   :  { %v806_v9 = vpop.permute.xlu0 %805 }
0x151e   :  { %808 = vst.msk [vmem:[#allocation3] sm:$0xff] %vm22_vm0, %v806_v9 }
0x152b   :  { %v794_v10 = vpop.permute.xlu1 %793 }
0x152c   :  { %v796_v11 = vmul.f32 %v1169_v62, %v794_v10 }
0x152e   :  { %798 = vrot.lane.b32.xlu1 %v796_v11, %s1175_s26 }
0x152f   :  { %v217_v13 = vpop.permute.xlu1 %216 }
0x1530   :  { %220 = vst.msk [vmem:[#allocation4 + $0x8] sm:$0xff] %vm22_vm0, %v217_v13 }
0x1533   :  { %v411_v14 = vpop.permute.xlu1 %410 }
0x1534   :  { %414 = vst.msk [vmem:[#allocation4 + $0x18] sm:$0xff] %vm22_vm0, %v411_v14 }
0x1537   :  { %v605_v51 = vpop.permute.xlu1 %604  ;;  %v810_v16 = vld [vmem:[#allocation4 + $0x8] sm:$0xff] }
0x1538   :  { %608 = vst.msk [vmem:[#allocation4 + $0x28] sm:$0xff] %vm22_vm0, %v605_v51  ;;  %v817_v36 = vpack.c.bf16 %v810_v16, %v809_v15 }
0x153a   :  { %1077 = vmatprep.mubr.msk.bf16.mxu0 %vm22_vm0, %v817_v36 }
0x153b   :  { %v812_v18 = vld [vmem:[#allocation4 + $0x18] sm:$0xff] }
0x153c   :  { %v818_v19 = vpack.c.bf16 %v812_v18, %v811_v17 }
0x153e   :  { %1078 = vmatmul.mubr.msk.bf16.vlgmr.msra.gmra.mxu0 %vm22_vm0, %v818_v19 }
0x153f   :  { %v814_v21 = vld [vmem:[#allocation4 + $0x28] sm:$0xff] }
0x1540   :  { %v819_v22 = vpack.c.bf16 %v814_v21, %v813_v20 }
0x1542   :  { %1081 = vmatprep.mubr.msk.bf16.mxu0 %vm22_vm0, %v819_v22 }
0x15a0   :  { %v799_v23 = vpop.permute.xlu1 %798 }
0x15a1   :  { %802 = vst.msk [vmem:[#allocation4 + $0x38] sm:$0xff] %vm22_vm0, %v799_v23  ;;  %803 = vst.msk [vmem:[#allocation2] sm:$0xff] %vm22_vm0, %v799_v23 }
0x15a8   :  { %v816_v25 = vld [vmem:[#allocation4 + $0x38] sm:$0xff] }
0x15a9   :  { %v820_v26 = vpack.c.bf16 %v816_v25, %v815_v24 }
0x15ab   :  { %1082 = vmatmul.mubr.msk.bf16.gmra.mxu0 %vm22_vm0, %v820_v26 }
0x15fe   :  { %v1079_v29 = vpop.f32.mrf.mxu0 }
0x15ff   :  { %v899_v30 = vadd.f32 %v1079_v29, %v972_v27 }
0x1600   :  { %v890_v31 = vpop.f32.mrf.mxu0 }
0x1601   :  { %923 = vst [vmem:[%s1427_s4 + $0x10] sm:$0xff] %v899_v30  ;;  %v891_v32 = vadd.f32 %v972_v27, %v890_v31 }
0x1602   :  { %v1080_v33 = vpop.f32.mrf.mxu0 }
0x1603   :  { %921 = vst [vmem:[%s1427_s4] sm:$0xff] %v891_v32  ;;  %v902_v34 = vadd.f32 %v1080_v33, %v972_v27 }
0x1604   :  { %v893_v35 = vpop.f32.mrf.mxu0 }
0x1605   :  { %924 = vst [vmem:[%s1427_s4 + $0x18] sm:$0xff] %v902_v34  ;;  %v894_v37 = vadd.f32 %v972_v27, %v893_v35 }
0x1607   :  { %922 = vst [vmem:[%s1427_s4 + $0x8] sm:$0xff] %v894_v37 }
0x166b   :  { %v1083_v38 = vpop.f32.mrf.mxu0 }
0x166c   :  { %v915_v39 = vadd.f32 %v1083_v38, %v972_v27 }
0x166d   :  { %v906_v40 = vpop.f32.mrf.mxu0 }
0x166e   :  { %927 = vst [vmem:[%s1427_s4 + $0x30] sm:$0xff] %v915_v39  ;;  %v907_v41 = vadd.f32 %v972_v27, %v906_v40 }
0x166f   :  { %v1084_v42 = vpop.f32.mrf.mxu0 }
0x1670   :  { %925 = vst [vmem:[%s1427_s4 + $0x20] sm:$0xff] %v907_v41  ;;  %v918_v43 = vadd.f32 %v1084_v42, %v972_v27 }
0x1671   :  { %v909_v44 = vpop.f32.mrf.mxu0 }
0x1672   :  { %928 = vst [vmem:[%s1427_s4 + $0x38] sm:$0xff] %v918_v43  ;;  %v910_v45 = vadd.f32 %v972_v27, %v909_v44 }
0x1674   :  { %926 = vst [vmem:[%s1427_s4 + $0x28] sm:$0xff] %v910_v45 }

</bundles_post_ra>
